<compile_context>
chip_gen: v7x
topology: tpu7x:2x2x1
jax: 0.10.0
libtpu: 0.0.40
codegen_flags: <defaults>
</compile_context>

<pallas_src>
import jax
import jax.numpy as jnp
from jax import lax
from jax.experimental import pallas as pl
from jax.experimental.pallas import tpu as pltpu

K = 5            # conv kernel size
PAD = 2          # 'same' padding for k=5, stride=1
NEG_SLOPE = 0.2  # LeakyReLU negative slope

# Contract the last dim of both operands (same form splash-attention uses).
NT_DIMS = (((1,), (1,)), ((), ()))


def resblock_kernel(x_ref, w_ref, b_ref, out_ref, xpad_ref, rows_ref, patches_ref):
    # x_ref       : (1, H, W, C)      unpadded NHWC image (resident across H tiles)
    # w_ref       : (C, K*K*C) bf16   conv2 weights as one 2-D im2col slab
    # b_ref       : (C, 1)    f32     conv2 bias
    # out_ref     : (1, 1, C, TH*W)   lane-dense transposed output tile
    # xpad_ref    : (TH+4, W+4, C) f32 scratch — zero-padded input tile (fused pad)
    # rows_ref    : (TH, W+4, K*C) f32 scratch — 5 row-shifted views
    # patches_ref : (TH*W, K*K*C) f32 scratch — im2col matrix
    THp, Wp, C = xpad_ref.shape
    TH, W = THp - 2 * PAD, Wp - 2 * PAD

    h = pl.program_id(1)
    nh = pl.num_programs(1)
    r0 = h * TH

    # ---- fused 'same' padding: zero the scratch, copy TH body rows + valid halos.
    xpad_ref[...] = jnp.zeros_like(xpad_ref)
    xpad_ref[pl.ds(PAD, TH), pl.ds(PAD, W), :] = x_ref[0, pl.ds(r0, TH), :, :]

    @pl.when(h > 0)
    def _():  # 2-row top halo from the previous tile
        xpad_ref[pl.ds(0, PAD), pl.ds(PAD, W), :] = x_ref[0, pl.ds(r0 - PAD, PAD), :, :]

    @pl.when(h < nh - 1)
    def _():  # 2-row bottom halo from the next tile
        xpad_ref[pl.ds(PAD + TH, PAD), pl.ds(PAD, W), :] = x_ref[0, pl.ds(r0 + TH, PAD), :, :]

    xpad = xpad_ref[...]                                   # (TH+4, W+4, C) f32

    # ---- im2col staging: 5 row shifts, then 5 column shifts -> (TH*W, K*K*C).
    # Column order is (kw, kh, ci) — must match the wrapper's weight slab layout.
    for kh in range(K):
        rows_ref[:, :, kh * C:(kh + 1) * C] = xpad[kh:kh + TH, :, :]
    rows = rows_ref[...]                                   # (TH, W+4, K*C)
    for kw in range(K):
        patches_ref[:, kw * K * C:(kw + 1) * K * C] = (
            rows[:, kw:kw + W, :].reshape(TH * W, K * C))
    patches = patches_ref[...].astype(jnp.bfloat16)        # (TH*W, K*K*C) bf16

    # ---- one fat MXU matmul, bf16 operands / f32 accumulation, output already
    #      transposed so the minor dim is the lane-dense TH*W axis.
    acc = lax.dot_general(w_ref[...], patches, NT_DIMS,
                          preferred_element_type=jnp.float32)       # (C, TH*W)

    # ---- residual (exact, f32): identity matmul moves x into the (C, TH*W) layout.
    interior = xpad[PAD:PAD + TH, PAD:PAD + W, :].reshape(TH * W, C)
    rr = lax.broadcasted_iota(jnp.int32, (C, C), 0)
    cc = lax.broadcasted_iota(jnp.int32, (C, C), 1)
    eye = (rr == cc).astype(jnp.float32)
    res_t = lax.dot_general(eye, interior, NT_DIMS,
                            preferred_element_type=jnp.float32)     # (C, TH*W)

    # ---- f32 epilogue: bias + residual + LeakyReLU(0.2); unmasked lane-dense store.
    y = acc + b_ref[...] + res_t
    y = jnp.where(y > 0.0, y, NEG_SLOPE * y)
    out_ref[0, 0] = y.astype(out_ref.dtype)


def resblock_forward(x, params, tile_h=None):
    """x: (N, C, H, W) float32 (NCHW, like PyTorch). Returns (N, C, H, W)."""
    N, C, H, W = x.shape
    assert params["w2"].shape == (C, C, K, K), \
        "residual add + conv2(x) require out_channel == in_channel"

    if tile_h is None:
        # Spatial H tile (must divide H, >= PAD). 16 -> 2 tiles of 8 so the grid has
        # two parallel axes (batch, H-tile) for v7x's two TensorCores. For large
        # images, pick TH so the per-step VMEM footprint (double-buffered image
        # block + f32 im2col scratch ~= TH*W*K*K*C*4 B) stays <~24 MiB on v7x
        # (64 MiB physical VMEM) — roughly half of what v5e/v6e tolerate.
        tile_h = 8 if H % 8 == 0 else H
    TH = tile_h
    assert H % TH == 0 and TH >= PAD
    NH = H // TH

    # conv2 weights: PyTorch OIHW -> (co, kw, kh, ci) -> one 2-D (C, K*K*C) slab
    # matching the kernel's im2col column order; bf16 MXU operands.
    w_t = jnp.transpose(params["w2"], (0, 3, 2, 1)).reshape(C, K * K * C)
    w_t = w_t.astype(jnp.bfloat16)
    b2 = params["b2"].reshape(C, 1).astype(jnp.float32)

    # No jnp.pad here — padding is fused inside the kernel.
    x_nhwc = jnp.transpose(x, (0, 2, 3, 1))                # (N, H, W, C)

    out_t = pl.pallas_call(
        resblock_kernel,
        out_shape=jax.ShapeDtypeStruct((N, NH, C, TH * W), x.dtype),
        grid_spec=pltpu.PrefetchScalarGridSpec(
            num_scalar_prefetch=0,
            grid=(N, NH),
            in_specs=[
                # Image block is constant across the H-tile axis -> DMA'd once per n.
                # TODO(synk): for very large H switch this to memory_space=pl.ANY +
                # manual halo DMA so input VMEM is bounded by the tile, not the image.
                pl.BlockSpec((1, H, W, C), lambda n, h: (n, 0, 0, 0)),
                pl.BlockSpec((C, K * K * C), lambda n, h: (0, 0)),
                pl.BlockSpec((C, 1), lambda n, h: (0, 0)),
            ],
            out_specs=pl.BlockSpec((1, 1, C, TH * W), lambda n, h: (n, h, 0, 0)),
            scratch_shapes=[
                pltpu.VMEM((TH + 2 * PAD, W + 2 * PAD, C), jnp.float32),
                pltpu.VMEM((TH, W + 2 * PAD, K * C), jnp.float32),
                pltpu.VMEM((TH * W, K * K * C), jnp.float32),
            ],
        ),
        compiler_params=pltpu.CompilerParams(
            dimension_semantics=("parallel", "parallel")),
    )(x_nhwc, w_t, b2)

    # (N, NH, C, TH*W) lane-dense kernel output -> NCHW.
    out = out_t.reshape(N, NH, C, TH, W).transpose(0, 2, 1, 3, 4).reshape(N, C, H, W)
    return out


def init_params(key, in_channel, out_channel):
    """Deterministic synthetic init matching the shapes from resblock.__init__."""
    k1, k2, k3, k4 = jax.random.split(key, 4)
    scale1 = 1.0 / (in_channel * K * K) ** 0.5
    scale2 = 1.0 / (out_channel * K * K) ** 0.5
    return {
        # conv1 params exist per __init__ but do not affect the reference output.
        "w1": jax.random.uniform(k1, (out_channel, in_channel, K, K),
                                 jnp.float32, -scale1, scale1),
        "b1": jax.random.uniform(k2, (out_channel,), jnp.float32, -scale1, scale1),
        "w2": jax.random.uniform(k3, (out_channel, out_channel, K, K),
                                 jnp.float32, -scale2, scale2),
        "b2": jax.random.uniform(k4, (out_channel,), jnp.float32, -scale2, scale2),
    }


def reference_forward(x, params):
    """Pure-JAX reference mirroring the PyTorch forward exactly (f32 everywhere)."""
    out = jax.lax.conv_general_dilated(
        x, params["w1"], (1, 1), [(PAD, PAD), (PAD, PAD)],
        dimension_numbers=("NCHW", "OIHW", "NCHW"),
    ) + params["b1"][None, :, None, None]
    out = jnp.where(out > 0, out, NEG_SLOPE * out)         # relu1 (result discarded)
    out = jax.lax.conv_general_dilated(
        x, params["w2"], (1, 1), [(PAD, PAD), (PAD, PAD)],
        dimension_numbers=("NCHW", "OIHW", "NCHW"),
    ) + params["b2"][None, :, None, None]
    out = out + x                                          # residual add
    out = jnp.where(out > 0, out, NEG_SLOPE * out)         # relu2
    return out


if __name__ == "__main__":
    # Forward requires out_channel == in_channel (residual add + conv2 on x).
    N, C, H, W = 2, 4, 16, 16
    key = jax.random.PRNGKey(0)
    kx, kp = jax.random.split(key)
    x = jax.random.normal(kx, (N, C, H, W), jnp.float32)
    params = init_params(kp, C, C)

    out = jax.block_until_ready(resblock_forward(x, params))
    ref = jax.block_until_ready(reference_forward(x, params))

    assert out.shape == (N, C, H, W)
    # bf16 MXU operands with f32 accumulation (residual/bias stay exact f32) ->
    # relaxed tolerance vs the all-f32 reference.
    assert jnp.allclose(out, ref, atol=3e-2, rtol=3e-2), \
        f"max abs err = {jnp.max(jnp.abs(out - ref))}"
    print("KERNEL_OK")
</pallas_src>

<mosaic_0001>
module attributes {stable_mosaic.version = 11 : i64} {
  func.func @resblock_kernel(%arg0: i32, %arg1: i32, %arg2: memref<1x16x16x4xf32, #tpu.memory_space<vmem>>, %arg3: memref<4x100xbf16, #tpu.memory_space<vmem>>, %arg4: memref<4x1xf32, #tpu.memory_space<vmem>>, %arg5: memref<1x1x4x128xf32, #tpu.memory_space<vmem>>, %arg6: memref<12x20x4xf32, #tpu.memory_space<vmem>>, %arg7: memref<8x20x20xf32, #tpu.memory_space<vmem>>, %arg8: memref<128x100xf32, #tpu.memory_space<vmem>>) attributes {dimension_semantics = [#tpu.dimension_semantics<parallel>, #tpu.dimension_semantics<parallel>], iteration_bounds = array<i64: 2, 2>, scalar_prefetch = 0 : i64, scratch_operands = 3 : i64, tpu.core_type = #tpu.core_type<tc>, window_params = [{transform_indices = @transform_0, window_bounds = array<i64: 1, 16, 16, 4>}, {pipeline_mode = #tpu.pipeline_mode<synchronous>, transform_indices = @transform_1, window_bounds = array<i64: 4, 100>}, {pipeline_mode = #tpu.pipeline_mode<synchronous>, transform_indices = @transform_2, window_bounds = array<i64: 4, 1>}, {transform_indices = @transform_3, window_bounds = array<i64: 1, 1, 4, 128>}]} {
    %c8_i32 = arith.constant 8 : i32
    %0 = arith.muli %arg1, %c8_i32 : i32
    %cst = arith.constant 0.000000e+00 : f32
    %1 = vector.broadcast %cst : f32 to vector<12x20x4xf32>
    %c0 = arith.constant 0 : index
    %c0_0 = arith.constant 0 : index
    %c0_1 = arith.constant 0 : index
    %2 = vector.load %arg6[%c0, %c0_0, %c0_1] : memref<12x20x4xf32, #tpu.memory_space<vmem>>, vector<12x20x4xf32>
    tpu.vector_store %arg6[%c0, %c0_0, %c0_1], %1 {strides = array<i32>} : memref<12x20x4xf32, #tpu.memory_space<vmem>>, vector<12x20x4xf32>,
    %c0_2 = arith.constant 0 : index
    %3 = arith.index_cast %0 : i32 to index
    %c0_3 = arith.constant 0 : index
    %c0_4 = arith.constant 0 : index
    %4 = vector.load %arg2[%c0_2, %3, %c0_3, %c0_4] : memref<1x16x16x4xf32, #tpu.memory_space<vmem>>, vector<1x8x16x4xf32>
    %5 = vector.shape_cast %4 : vector<1x8x16x4xf32> to vector<8x16x4xf32>
    %c2 = arith.constant 2 : index
    %c2_5 = arith.constant 2 : index
    %c0_6 = arith.constant 0 : index
    %6 = vector.load %arg6[%c2, %c2_5, %c0_6] : memref<12x20x4xf32, #tpu.memory_space<vmem>>, vector<8x16x4xf32>
    tpu.vector_store %arg6[%c2, %c2_5, %c0_6], %5 {strides = array<i32>} : memref<12x20x4xf32, #tpu.memory_space<vmem>>, vector<8x16x4xf32>,
    %c0_i32 = arith.constant 0 : i32
    %7 = arith.cmpi sgt, %arg1, %c0_i32 : i32
    %8 = arith.extui %7 : i1 to i32
    %c0_i32_7 = arith.constant 0 : i32
    %9 = arith.cmpi ne, %8, %c0_i32_7 : i32
    scf.if %9 {
      %c2_i32 = arith.constant 2 : i32
      %64 = arith.subi %0, %c2_i32 : i32
      %c0_46 = arith.constant 0 : index
      %65 = arith.index_cast %64 : i32 to index
      %c0_47 = arith.constant 0 : index
      %c0_48 = arith.constant 0 : index
      %66 = vector.load %arg2[%c0_46, %65, %c0_47, %c0_48] : memref<1x16x16x4xf32, #tpu.memory_space<vmem>>, vector<1x2x16x4xf32>
      %67 = vector.shape_cast %66 : vector<1x2x16x4xf32> to vector<2x16x4xf32>
      %c0_49 = arith.constant 0 : index
      %c2_50 = arith.constant 2 : index
      %c0_51 = arith.constant 0 : index
      %68 = vector.load %arg6[%c0_49, %c2_50, %c0_51] : memref<12x20x4xf32, #tpu.memory_space<vmem>>, vector<2x16x4xf32>
      tpu.vector_store %arg6[%c0_49, %c2_50, %c0_51], %67 {strides = array<i32>} : memref<12x20x4xf32, #tpu.memory_space<vmem>>, vector<2x16x4xf32>,
    } else {
    }
    %c1_i32 = arith.constant 1 : i32
    %10 = arith.cmpi slt, %arg1, %c1_i32 : i32
    %11 = arith.extui %10 : i1 to i32
    %c0_i32_8 = arith.constant 0 : i32
    %12 = arith.cmpi ne, %11, %c0_i32_8 : i32
    scf.if %12 {
      %c8_i32_46 = arith.constant 8 : i32
      %64 = arith.addi %0, %c8_i32_46 : i32
      %c0_47 = arith.constant 0 : index
      %65 = arith.index_cast %64 : i32 to index
      %c0_48 = arith.constant 0 : index
      %c0_49 = arith.constant 0 : index
      %66 = vector.load %arg2[%c0_47, %65, %c0_48, %c0_49] : memref<1x16x16x4xf32, #tpu.memory_space<vmem>>, vector<1x2x16x4xf32>
      %67 = vector.shape_cast %66 : vector<1x2x16x4xf32> to vector<2x16x4xf32>
      %c10 = arith.constant 10 : index
      %c2_50 = arith.constant 2 : index
      %c0_51 = arith.constant 0 : index
      %68 = vector.load %arg6[%c10, %c2_50, %c0_51] : memref<12x20x4xf32, #tpu.memory_space<vmem>>, vector<2x16x4xf32>
      tpu.vector_store %arg6[%c10, %c2_50, %c0_51], %67 {strides = array<i32>} : memref<12x20x4xf32, #tpu.memory_space<vmem>>, vector<2x16x4xf32>,
    } else {
    }
    %c0_9 = arith.constant 0 : index
    %c0_10 = arith.constant 0 : index
    %c0_11 = arith.constant 0 : index
    %13 = vector.load %arg6[%c0_9, %c0_10, %c0_11] : memref<12x20x4xf32, #tpu.memory_space<vmem>>, vector<12x20x4xf32>
    %14 = vector.extract_strided_slice %13 {offsets = [0, 0, 0], sizes = [8, 20, 4], strides = [1, 1, 1]} : vector<12x20x4xf32> to vector<8x20x4xf32>
    %c0_12 = arith.constant 0 : index
    %c0_13 = arith.constant 0 : index
    %c0_14 = arith.constant 0 : index
    %15 = vector.load %arg7[%c0_12, %c0_13, %c0_14] : memref<8x20x20xf32, #tpu.memory_space<vmem>>, vector<8x20x4xf32>
    tpu.vector_store %arg7[%c0_12, %c0_13, %c0_14], %14 {strides = array<i32>} : memref<8x20x20xf32, #tpu.memory_space<vmem>>, vector<8x20x4xf32>,
    %16 = vector.extract_strided_slice %13 {offsets = [1, 0, 0], sizes = [8, 20, 4], strides = [1, 1, 1]} : vector<12x20x4xf32> to vector<8x20x4xf32>
    %c0_15 = arith.constant 0 : index
    %c0_16 = arith.constant 0 : index
    %c4 = arith.constant 4 : index
    %17 = vector.load %arg7[%c0_15, %c0_16, %c4] : memref<8x20x20xf32, #tpu.memory_space<vmem>>, vector<8x20x4xf32>
    tpu.vector_store %arg7[%c0_15, %c0_16, %c4], %16 {strides = array<i32>} : memref<8x20x20xf32, #tpu.memory_space<vmem>>, vector<8x20x4xf32>,
    %18 = vector.extract_strided_slice %13 {offsets = [2, 0, 0], sizes = [8, 20, 4], strides = [1, 1, 1]} : vector<12x20x4xf32> to vector<8x20x4xf32>
    %c0_17 = arith.constant 0 : index
    %c0_18 = arith.constant 0 : index
    %c8 = arith.constant 8 : index
    %19 = vector.load %arg7[%c0_17, %c0_18, %c8] : memref<8x20x20xf32, #tpu.memory_space<vmem>>, vector<8x20x4xf32>
    tpu.vector_store %arg7[%c0_17, %c0_18, %c8], %18 {strides = array<i32>} : memref<8x20x20xf32, #tpu.memory_space<vmem>>, vector<8x20x4xf32>,
    %20 = vector.extract_strided_slice %13 {offsets = [3, 0, 0], sizes = [8, 20, 4], strides = [1, 1, 1]} : vector<12x20x4xf32> to vector<8x20x4xf32>
    %c0_19 = arith.constant 0 : index
    %c0_20 = arith.constant 0 : index
    %c12 = arith.constant 12 : index
    %21 = vector.load %arg7[%c0_19, %c0_20, %c12] : memref<8x20x20xf32, #tpu.memory_space<vmem>>, vector<8x20x4xf32>
    tpu.vector_store %arg7[%c0_19, %c0_20, %c12], %20 {strides = array<i32>} : memref<8x20x20xf32, #tpu.memory_space<vmem>>, vector<8x20x4xf32>,
    %22 = vector.extract_strided_slice %13 {offsets = [4, 0, 0], sizes = [8, 20, 4], strides = [1, 1, 1]} : vector<12x20x4xf32> to vector<8x20x4xf32>
    %c0_21 = arith.constant 0 : index
    %c0_22 = arith.constant 0 : index
    %c16 = arith.constant 16 : index
    %23 = vector.load %arg7[%c0_21, %c0_22, %c16] : memref<8x20x20xf32, #tpu.memory_space<vmem>>, vector<8x20x4xf32>
    tpu.vector_store %arg7[%c0_21, %c0_22, %c16], %22 {strides = array<i32>} : memref<8x20x20xf32, #tpu.memory_space<vmem>>, vector<8x20x4xf32>,
    %c0_23 = arith.constant 0 : index
    %c0_24 = arith.constant 0 : index
    %c0_25 = arith.constant 0 : index
    %24 = vector.load %arg7[%c0_23, %c0_24, %c0_25] : memref<8x20x20xf32, #tpu.memory_space<vmem>>, vector<8x20x20xf32>
    %25 = vector.extract_strided_slice %24 {offsets = [0, 0, 0], sizes = [8, 16, 20], strides = [1, 1, 1]} : vector<8x20x20xf32> to vector<8x16x20xf32>
    %26 = vector.shape_cast %25 : vector<8x16x20xf32> to vector<128x20xf32>
    %c0_26 = arith.constant 0 : index
    %c0_27 = arith.constant 0 : index
    %27 = vector.load %arg8[%c0_26, %c0_27] : memref<128x100xf32, #tpu.memory_space<vmem>>, vector<128x20xf32>
    tpu.vector_store %arg8[%c0_26, %c0_27], %26 {strides = array<i32>} : memref<128x100xf32, #tpu.memory_space<vmem>>, vector<128x20xf32>,
    %28 = vector.extract_strided_slice %24 {offsets = [0, 1, 0], sizes = [8, 16, 20], strides = [1, 1, 1]} : vector<8x20x20xf32> to vector<8x16x20xf32>
    %29 = vector.shape_cast %28 : vector<8x16x20xf32> to vector<128x20xf32>
    %c0_28 = arith.constant 0 : index
    %c20 = arith.constant 20 : index
    %30 = vector.load %arg8[%c0_28, %c20] : memref<128x100xf32, #tpu.memory_space<vmem>>, vector<128x20xf32>
    tpu.vector_store %arg8[%c0_28, %c20], %29 {strides = array<i32>} : memref<128x100xf32, #tpu.memory_space<vmem>>, vector<128x20xf32>,
    %31 = vector.extract_strided_slice %24 {offsets = [0, 2, 0], sizes = [8, 16, 20], strides = [1, 1, 1]} : vector<8x20x20xf32> to vector<8x16x20xf32>
    %32 = vector.shape_cast %31 : vector<8x16x20xf32> to vector<128x20xf32>
    %c0_29 = arith.constant 0 : index
    %c40 = arith.constant 40 : index
    %33 = vector.load %arg8[%c0_29, %c40] : memref<128x100xf32, #tpu.memory_space<vmem>>, vector<128x20xf32>
    tpu.vector_store %arg8[%c0_29, %c40], %32 {strides = array<i32>} : memref<128x100xf32, #tpu.memory_space<vmem>>, vector<128x20xf32>,
    %34 = vector.extract_strided_slice %24 {offsets = [0, 3, 0], sizes = [8, 16, 20], strides = [1, 1, 1]} : vector<8x20x20xf32> to vector<8x16x20xf32>
    %35 = vector.shape_cast %34 : vector<8x16x20xf32> to vector<128x20xf32>
    %c0_30 = arith.constant 0 : index
    %c60 = arith.constant 60 : index
    %36 = vector.load %arg8[%c0_30, %c60] : memref<128x100xf32, #tpu.memory_space<vmem>>, vector<128x20xf32>
    tpu.vector_store %arg8[%c0_30, %c60], %35 {strides = array<i32>} : memref<128x100xf32, #tpu.memory_space<vmem>>, vector<128x20xf32>,
    %37 = vector.extract_strided_slice %24 {offsets = [0, 4, 0], sizes = [8, 16, 20], strides = [1, 1, 1]} : vector<8x20x20xf32> to vector<8x16x20xf32>
    %38 = vector.shape_cast %37 : vector<8x16x20xf32> to vector<128x20xf32>
    %c0_31 = arith.constant 0 : index
    %c80 = arith.constant 80 : index
    %39 = vector.load %arg8[%c0_31, %c80] : memref<128x100xf32, #tpu.memory_space<vmem>>, vector<128x20xf32>
    tpu.vector_store %arg8[%c0_31, %c80], %38 {strides = array<i32>} : memref<128x100xf32, #tpu.memory_space<vmem>>, vector<128x20xf32>,
    %c0_32 = arith.constant 0 : index
    %c0_33 = arith.constant 0 : index
    %40 = vector.load %arg8[%c0_32, %c0_33] : memref<128x100xf32, #tpu.memory_space<vmem>>, vector<128x100xf32>
    %41 = arith.truncf %40 : vector<128x100xf32> to vector<128x100xbf16>
    %c0_34 = arith.constant 0 : index
    %c0_35 = arith.constant 0 : index
    %42 = vector.load %arg3[%c0_34, %c0_35] : memref<4x100xbf16, #tpu.memory_space<vmem>>, vector<4x100xbf16>
    %cst_36 = arith.constant dense<0.000000e+00> : vector<4x128xf32>
    %43 = tpu.matmul %42, %41, %cst_36 {dimension_numbers = #tpu.dot_dimension_numbers<[1], [1], [0], [0], [0, 0, 1, 0], [], []>} : vector<4x100xbf16>, vector<128x100xbf16>, vector<4x128xf32> -> vector<4x128xf32>
    %44 = vector.extract_strided_slice %13 {offsets = [2, 2, 0], sizes = [8, 16, 4], strides = [1, 1, 1]} : vector<12x20x4xf32> to vector<8x16x4xf32>
    %45 = vector.shape_cast %44 : vector<8x16x4xf32> to vector<128x4xf32>
    %46 = tpu.iota {dimensions = array<i32: 0>} : vector<4x4xi32>
    %47 = tpu.iota {dimensions = array<i32: 1>} : vector<4x4xi32>
    %48 = arith.cmpi eq, %46, %47 : vector<4x4xi32>
    %49 = arith.extui %48 : vector<4x4xi1> to vector<4x4xi32>
    %50 = arith.sitofp %49 : vector<4x4xi32> to vector<4x4xf32>
    %cst_37 = arith.constant dense<0.000000e+00> : vector<4x128xf32>
    %51 = tpu.matmul %50, %45, %cst_37 {dimension_numbers = #tpu.dot_dimension_numbers<[1], [1], [0], [0], [0, 0, 1, 0], [], []>} : vector<4x4xf32>, vector<128x4xf32>, vector<4x128xf32> -> vector<4x128xf32>
    %c0_38 = arith.constant 0 : index
    %c0_39 = arith.constant 0 : index
    %52 = vector.load %arg4[%c0_38, %c0_39] : memref<4x1xf32, #tpu.memory_space<vmem>>, vector<4x1xf32>
    %53 = vector.broadcast %52 : vector<4x1xf32> to vector<4x128xf32>
    %54 = arith.addf %43, %53 : vector<4x128xf32>
    %55 = arith.addf %54, %51 : vector<4x128xf32>
    %cst_40 = arith.constant 0.000000e+00 : f32
    %56 = vector.broadcast %cst_40 : f32 to vector<4x128xf32>
    %57 = arith.cmpf ogt, %55, %56 : vector<4x128xf32>
    %cst_41 = arith.constant 2.000000e-01 : f32
    %58 = vector.broadcast %cst_41 : f32 to vector<4x128xf32>
    %59 = arith.mulf %58, %55 : vector<4x128xf32>
    %60 = arith.select %57, %55, %59 : vector<4x128xi1>, vector<4x128xf32>
    %c0_42 = arith.constant 0 : index
    %c0_43 = arith.constant 0 : index
    %c0_44 = arith.constant 0 : index
    %c0_45 = arith.constant 0 : index
    %61 = vector.load %arg5[%c0_42, %c0_43, %c0_44, %c0_45] : memref<1x1x4x128xf32, #tpu.memory_space<vmem>>, vector<1x1x4x128xf32>
    %62 = vector.shape_cast %61 : vector<1x1x4x128xf32> to vector<4x128xf32>
    %63 = vector.shape_cast %60 : vector<4x128xf32> to vector<1x1x4x128xf32>
    tpu.vector_store %arg5[%c0_42, %c0_43, %c0_44, %c0_45], %63 {strides = array<i32>} : memref<1x1x4x128xf32, #tpu.memory_space<vmem>>, vector<1x1x4x128xf32>,
    return
  }
  func.func @transform_0(%arg0: i32, %arg1: i32) -> (i32, i32, i32, i32) {
    %c0_i32 = arith.constant 0 : i32
    %c0_i32_0 = arith.constant 0 : i32
    %c0_i32_1 = arith.constant 0 : i32
    %c0_i32_2 = arith.constant 0 : i32
    return %arg0, %c0_i32, %c0_i32_0, %c0_i32_1 : i32, i32, i32, i32
  }
  func.func @transform_1(%arg0: i32, %arg1: i32) -> (i32, i32) {
    %c0_i32 = arith.constant 0 : i32
    %c0_i32_0 = arith.constant 0 : i32
    %c0_i32_1 = arith.constant 0 : i32
    return %c0_i32, %c0_i32_0 : i32, i32
  }
  func.func @transform_2(%arg0: i32, %arg1: i32) -> (i32, i32) {
    %c0_i32 = arith.constant 0 : i32
    %c0_i32_0 = arith.constant 0 : i32
    %c0_i32_1 = arith.constant 0 : i32
    return %c0_i32, %c0_i32_0 : i32, i32
  }
  func.func @transform_3(%arg0: i32, %arg1: i32) -> (i32, i32, i32, i32) {
    %c0_i32 = arith.constant 0 : i32
    %c0_i32_0 = arith.constant 0 : i32
    %c0_i32_1 = arith.constant 0 : i32
    return %arg0, %arg1, %c0_i32, %c0_i32_0 : i32, i32, i32, i32
  }
}

</mosaic_0001>

<bundles_post_ra>
// kernel: tpu_custom_call.1
= control target key start
LH: loop header
LB: loop body
LE: loop exit
PB: predicated region body
PF: predicated region fallthrough
CT: control target
= control target key end

     0   :  { %8 = vsyncpa [#allocation6], 0  ;;  %s3050_s0 = inlined_call_operand.vmem [shape: f32[2,16,16,4], index: 0, kind: input, shape index: {}]   ;;  %s3051_s1 = inlined_call_operand.vmem [shape: bf16[4,100], index: 1, kind: input, shape index: {}]   ;;  %s3052_s2 = inlined_call_operand.vmem [shape: f32[4,1], index: 2, kind: input, shape index: {}]   ;;  %s3053_s3 = inlined_call_operand.hbm [shape: f32[2,2,4,128], index: 3, kind: output, shape index: {}]  }
   0x1   :  { %10 = vsyncpa [#allocation6 + $0x1], 0  ;;  %s1994_s12 = smov 0   ;;  %s1996_s13 = smov 0  }
   0x2   :  { %s1998_s14 = smov 0   ;;  %s2000_s15 = smov 0  }
   0x3   :  { %s2002_s16 = smov 0   ;;  %s2004_s17 = smov 0  }
   0x4   :  { %s2006_s18 = smov 0   ;;  %s2008_s19 = smov 0  }
   0x5 LB: > { %s1615_s20 = sadd.s32 4294967295, %s1959_s19   ;;  %s1616_s21 = sadd.s32 4294967294, %s1959_s19   ;;  %s1959_s19 = sphi %s2008_s19, %s16_s19   ;;  %s1955_s18 = sphi %s2006_s18, %s3064_s18   ;;  %s1951_s17 = sphi %s2004_s17, %s3063_s17   ;;  %s1947_s16 = sphi %s2002_s16, %s3062_s16   ;;  %s1943_s15 = sphi %s2000_s15, %s3061_s15   ;;  %s1939_s14 = sphi %s1998_s14, %s3060_s14   ;;  %s1935_s13 = sphi %s1996_s13, %s3059_s13   ;;  %s1931_s12 = sphi %s1994_s12, %s3058_s12  }
   0x6   : > { %s25_s22 = sadd.s32 1, %s1951_s17  ;;  %s28_s23 = sadd.s32 1, %s1955_s18 }
   0x7   : > { %p26_p0 = scmp.ge.s32.totalorder %s25_s22, 2  ;;  %p115_p1 = scmp.ne.s32.totalorder %s1939_s14, %s1935_s13 }
   0x8   : > { %p116_p2 = scmp.eq.s32.totalorder %s1615_s20, 3  ;;  %p121_p5 = scmp.ne.s32.totalorder %s1935_s13, %s1931_s12 }
   0x9   : > { %s3066_s22 = smov (%p26_p0, %s25_s22), 0  ;;  %s3068_s23 = smov (!%p26_p0, %s28_s23), %s1955_s18 }
   0xa   : > { %s101_s24 = ssub.s32 %s1951_s17, %s3066_s22  ;;  %p2045_p3 = por %p116_p2, %p115_p1 }
   0xb   : > { %p30_p4 = scmp.ge.s32.totalorder %s3068_s23, 2  ;;  %p122_p6 = scmp.eq.s32.totalorder %s1616_s21, 3 }
   0xc   : > { %p1619_p7 = scmp.ge.s32.totalorder %s1959_s19, 1  ;;  %p154_p9 = scmp.lt.s32.totalorder %s1959_s19, 5 }
   0xd   : > { %s3070_s23 = smov (%p30_p4, %s3068_s23), 0  ;;  %p2054_p8 = por %p122_p6, %p121_p5 }
   0xe   : > { %s100_s27 = ssub.s32 %s1955_s18, %s3070_s23  ;;  %s105_s28 = sadd.s32 1, %s1939_s14 }
   0xf   : > { %s102_s29 = sor.u32 %s101_s24, %s100_s27  ;;  %p155_p10 = pnand %p1619_p7, %p154_p9 }
  0x10   : > { %p103_p11 = scmp.eq.s32.totalorder %s102_s29, 0  ;;  %vm185_vm0 = vcmask (!%p155_p10), 31744   ;;  %vm188_vm1 = vcmask (!%p155_p10), 27648   ;;  %s175_s4 = sand.u32 (!%p155_p10), 1, %s1935_s13   ;;  %v1961_v0 = vmov (!%p155_p10), 0.0  }
  0x11   : > { %158 = sbr.rel (%p155_p10) target bundleno = 749 (0x2ed), region = 32  ;;  %s1623_s5 = sshll.u32 (!%p155_p10), %s1943_s15, 3  ;;  %193 = vst.msk [vmem:[#allocation2 + $0x30] sm:$0xff] (!%p155_p10), %vm185_vm0, %v1961_v0  ;;  %186 = vst.msk [vmem:[#allocation2] sm:$0xff] (!%p155_p10), %vm185_vm0, %v1961_v0 }
  0x12   : > { %s2063_s30 = scalar_select %p103_p11, %s1939_s14, %s105_s28  }
  0x13   : > { %187 = vst.msk [vmem:[#allocation2 + $0x8] sm:$0xff] (!%p155_p10), %vm185_vm0, %v1961_v0  ;;  %190 = vst.msk [vmem:[#allocation2 + $0x18] sm:$0xff] (!%p155_p10), %vm185_vm0, %v1961_v0  ;;  %s2141_s6 = sshll.u32 (!%p155_p10), %s175_s4, 2  ;;  %p178_p12 = scmp.lt.s32.totalorder (!%p155_p10), %s1947_s16, 1 }
  0x14   : > { %191 = vst.msk [vmem:[#allocation2 + $0x20] sm:$0xff] (!%p155_p10), %vm185_vm0, %v1961_v0  ;;  %194 = vst.msk [vmem:[#allocation2 + $0x38] sm:$0xff] (!%p155_p10), %vm185_vm0, %v1961_v0  ;;  %s1660_s8 = sshll.u32 (!%p155_p10), %s1943_s15, 7  ;;  %s177_s24 = scalar_lea.vmem (!%p155_p10), [#allocation5], %s2141_s6 }
  0x15   : > { %196 = vst.msk [vmem:[#allocation2 + $0x48] sm:$0xff] (!%p155_p10), %vm185_vm0, %v1961_v0  ;;  %197 = vst.msk [vmem:[#allocation2 + $0x50] sm:$0xff] (!%p155_p10), %vm185_vm0, %v1961_v0  ;;  %p1625_p13 = scmp.le.s32.totalorder (!%p155_p10), %s1943_s15, 0 }
  0x16   : > { %199 = vst.msk [vmem:[#allocation2 + $0x60] sm:$0xff] (!%p155_p10), %vm185_vm0, %v1961_v0  ;;  %200 = vst.msk [vmem:[#allocation2 + $0x68] sm:$0xff] (!%p155_p10), %vm185_vm0, %v1961_v0 }
  0x17   : > { %202 = vst.msk [vmem:[#allocation2 + $0x78] sm:$0xff] (!%p155_p10), %vm185_vm0, %v1961_v0  ;;  %203 = vst.msk [vmem:[#allocation2 + $0x80] sm:$0xff] (!%p155_p10), %vm185_vm0, %v1961_v0 }
  0x18   : > { %205 = vst.msk [vmem:[#allocation2 + $0x90] sm:$0xff] %vm185_vm0, %v1961_v0  ;;  %206 = vst.msk [vmem:[#allocation2 + $0x98] sm:$0xff] %vm185_vm0, %v1961_v0  ;;  %s179_s7 = scalar_select %p178_p12, %s1947_s16, 1 }
  0x19   : > { %208 = vst.msk [vmem:[#allocation2 + $0xa8] sm:$0xff] %vm185_vm0, %v1961_v0  ;;  %209 = vst.msk [vmem:[#allocation2 + $0xb0] sm:$0xff] %vm185_vm0, %v1961_v0  ;;  %s1626_s27 = sadd.s32 (!%p1625_p13), 4294967294, %s1623_s5 }
  0x1a   : > { %211 = vst.msk [vmem:[#allocation2 + $0xc0] sm:$0xff] %vm185_vm0, %v1961_v0  ;;  %212 = vst.msk [vmem:[#allocation2 + $0xc8] sm:$0xff] %vm185_vm0, %v1961_v0  ;;  %s1659_s9 = sshll.u32 %s179_s7, 8  ;;  %s1627_s28 = sshll.u32 (!%p1625_p13), %s1626_s27, 4 }
  0x1b   : > { %214 = vst.msk [vmem:[#allocation2 + $0xd8] sm:$0xff] %vm185_vm0, %v1961_v0  ;;  %215 = vst.msk [vmem:[#allocation2 + $0xe0] sm:$0xff] %vm185_vm0, %v1961_v0  ;;  %s2149_s20 = scalar_lea.vmem %s3050_s0, %s1659_s9 }
  0x1c   : > { %217 = vst.msk [vmem:[#allocation2 + $0xf0] sm:$0xff] %vm185_vm0, %v1961_v0  ;;  %218 = vst.msk [vmem:[#allocation2 + $0xf8] sm:$0xff] %vm185_vm0, %v1961_v0  ;;  %s2152_s21 = scalar_lea.vmem %s2149_s20, %s1660_s8  ;;  %s264_s29 = scalar_lea.vmem (!%p1625_p13), %s2149_s20, %s1627_s28 }
  0x1d   : > { %220 = vst.msk [vmem:[#allocation2 + $0x108] sm:$0xff] %vm185_vm0, %v1961_v0  ;;  %221 = vst.msk [vmem:[#allocation2 + $0x110] sm:$0xff] %vm185_vm0, %v1961_v0  ;;  %v225_v1 = vld [vmem:[%s2152_s21] sm:$0xff]  ;;  %v226_v2 = vld [vmem:[%s2152_s21 + $0x8] sm:$0xff] }
  0x1e   : > { %195 = vst.msk [vmem:[#allocation2 + $0x40] sm:$0xf] %vm188_vm1, %v1961_v0  ;;  %189 = vst.msk [vmem:[#allocation2 + $0x10] sm:$0xf] %vm188_vm1, %v1961_v0  ;;  %v227_v3 = vld [vmem:[%s2152_s21 + $0x10] sm:$0xff]  ;;  %v228_v4 = vld [vmem:[%s2152_s21 + $0x18] sm:$0xff] }
  0x1f   : > { %192 = vst.msk [vmem:[#allocation2 + $0x28] sm:$0xf] %vm188_vm1, %v1961_v0  ;;  %198 = vst.msk [vmem:[#allocation2 + $0x58] sm:$0xf] %vm188_vm1, %v1961_v0  ;;  %v229_v5 = vld [vmem:[%s2152_s21 + $0x20] sm:$0xff]  ;;  %v230_v6 = vld [vmem:[%s2152_s21 + $0x28] sm:$0xff] }
  0x20   : > { %201 = vst.msk [vmem:[#allocation2 + $0x70] sm:$0xf] %vm188_vm1, %v1961_v0  ;;  %204 = vst.msk [vmem:[#allocation2 + $0x88] sm:$0xf] %vm188_vm1, %v1961_v0  ;;  %v231_v7 = vld [vmem:[%s2152_s21 + $0x30] sm:$0xff]  ;;  %v232_v8 = vld [vmem:[%s2152_s21 + $0x38] sm:$0xff] }
  0x21   : > { %207 = vst.msk [vmem:[#allocation2 + $0xa0] sm:$0xf] %vm188_vm1, %v1961_v0  ;;  %210 = vst.msk [vmem:[#allocation2 + $0xb8] sm:$0xf] %vm188_vm1, %v1961_v0  ;;  %v233_v9 = vld [vmem:[%s2152_s21 + $0x40] sm:$0xff]  ;;  %v234_v10 = vld [vmem:[%s2152_s21 + $0x48] sm:$0xff] }
  0x22   : > { %213 = vst.msk [vmem:[#allocation2 + $0xd0] sm:$0xf] %vm188_vm1, %v1961_v0  ;;  %216 = vst.msk [vmem:[#allocation2 + $0xe8] sm:$0xf] %vm188_vm1, %v1961_v0  ;;  %v235_v11 = vld [vmem:[%s2152_s21 + $0x50] sm:$0xff]  ;;  %v236_v12 = vld [vmem:[%s2152_s21 + $0x58] sm:$0xff] }
  0x23   : > { %219 = vst.msk [vmem:[#allocation2 + $0x100] sm:$0xf] %vm188_vm1, %v1961_v0  ;;  %222 = vst.msk [vmem:[#allocation2 + $0x118] sm:$0xf] %vm188_vm1, %v1961_v0  ;;  %v237_v13 = vld [vmem:[%s2152_s21 + $0x60] sm:$0xff]  ;;  %v238_v14 = vld [vmem:[%s2152_s21 + $0x68] sm:$0xff] }
  0x24   : > { %242 = vst.msk [vmem:[#allocation2 + $0x32] sm:$0xff] %vm185_vm0, %v225_v1  ;;  %243 = vst.msk [vmem:[#allocation2 + $0x3a] sm:$0xff] %vm185_vm0, %v226_v2  ;;  %v239_v15 = vld [vmem:[%s2152_s21 + $0x70] sm:$0xff]  ;;  %v240_v16 = vld [vmem:[%s2152_s21 + $0x78] sm:$0xff] }
  0x25   : > { %244 = vst.msk [vmem:[#allocation2 + $0x4a] sm:$0xff] %vm185_vm0, %v227_v3  ;;  %245 = vst.msk [vmem:[#allocation2 + $0x52] sm:$0xff] %vm185_vm0, %v228_v4  ;;  %261 = sbr.rel (%p1625_p13) target bundleno = 46 (0x2e), region = 36  ;;  %v265_v17 = vld [vmem:[%s264_s29] sm:$0xff] (!%p1625_p13)  ;;  %v266_v18 = vld [vmem:[%s264_s29 + $0x8] sm:$0xff] (!%p1625_p13) }
  0x26   : > { %246 = vst.msk [vmem:[#allocation2 + $0x62] sm:$0xff] %vm185_vm0, %v229_v5  ;;  %247 = vst.msk [vmem:[#allocation2 + $0x6a] sm:$0xff] %vm185_vm0, %v230_v6  ;;  %v267_v19 = vld [vmem:[%s264_s29 + $0x10] sm:$0xff] (!%p1625_p13)  ;;  %v268_v20 = vld [vmem:[%s264_s29 + $0x18] sm:$0xff] (!%p1625_p13) }
  0x27   : > { %248 = vst.msk [vmem:[#allocation2 + $0x7a] sm:$0xff] %vm185_vm0, %v231_v7  ;;  %249 = vst.msk [vmem:[#allocation2 + $0x82] sm:$0xff] %vm185_vm0, %v232_v8 }
  0x28   : > { %250 = vst.msk [vmem:[#allocation2 + $0x92] sm:$0xff] %vm185_vm0, %v233_v9  ;;  %251 = vst.msk [vmem:[#allocation2 + $0x9a] sm:$0xff] %vm185_vm0, %v234_v10 }
  0x29   : > { %252 = vst.msk [vmem:[#allocation2 + $0xaa] sm:$0xff] %vm185_vm0, %v235_v11  ;;  %253 = vst.msk [vmem:[#allocation2 + $0xb2] sm:$0xff] %vm185_vm0, %v236_v12 }
  0x2a   : > { %254 = vst.msk [vmem:[#allocation2 + $0xc2] sm:$0xff] %vm185_vm0, %v237_v13  ;;  %255 = vst.msk [vmem:[#allocation2 + $0xca] sm:$0xff] %vm185_vm0, %v238_v14 }
  0x2b   : > { %256 = vst.msk [vmem:[#allocation2 + $0xda] sm:$0xff] %vm185_vm0, %v239_v15  ;;  %257 = vst.msk [vmem:[#allocation2 + $0xe2] sm:$0xff] %vm185_vm0, %v240_v16 }
  0x2c   : > { %269 = vst.msk [vmem:[#allocation2 + $0x2] sm:$0xff] %vm185_vm0, %v265_v17  ;;  %270 = vst.msk [vmem:[#allocation2 + $0xa] sm:$0xff] %vm185_vm0, %v266_v18 }
  0x2d   : > { %271 = vst.msk [vmem:[#allocation2 + $0x1a] sm:$0xff] %vm185_vm0, %v267_v19  ;;  %272 = vst.msk [vmem:[#allocation2 + $0x22] sm:$0xff] %vm185_vm0, %v268_v20 }
  0x2e PF: > { %p1628_p0 = scmp.ge.s32.totalorder %s1943_s15, 1 }
  0x2f   : > { %v1631_v21 = vld [vmem:[%s2152_s21 + $0x80] sm:$0xff] (!%p1628_p0)  ;;  %v1632_v22 = vld [vmem:[%s2152_s21 + $0x88] sm:$0xff] (!%p1628_p0)  ;;  %v1633_v23 = vld [vmem:[%s2152_s21 + $0x90] sm:$0xff] (!%p1628_p0) }
  0x30   : > { %276 = sbr.rel (%p1628_p0) target bundleno = 55 (0x37), region = 40  ;;  %285 = vst.msk [vmem:[#allocation2 + $0xf2] sm:$0xff] (!%p1628_p0), %vm185_vm0, %v1631_v21  ;;  %286 = vst.msk [vmem:[#allocation2 + $0xfa] sm:$0xff] (!%p1628_p0), %vm185_vm0, %v1632_v22  ;;  %v1634_v24 = vld [vmem:[%s2152_s21 + $0x98] sm:$0xff] (!%p1628_p0) }
  0x31   : > { %287 = vst.msk [vmem:[#allocation2 + $0x10a] sm:$0xff] (!%p1628_p0), %vm185_vm0, %v1633_v23  ;;  %288 = vst.msk [vmem:[#allocation2 + $0x112] sm:$0xff] (!%p1628_p0), %vm185_vm0, %v1634_v24 }
  0x37 PF: > { %v294_v25 = vld [vmem:[#allocation2 + $0x28] sm:$0xf]  ;;  %v292_v26 = vld [vmem:[#allocation2 + $0x18] sm:$0xff]  ;;  %v2204_v27 = vld [vmem:[#allocation2 + $0x30] sm:$0xff]  ;;  %1723 = vmatprep.subr.bf16.mxu1 %v1961_v0  ;;  %s1962_s5 = smov 4   ;;  %s1963_s7 = smov 8  }
  0x38   : > { %377 = vrot.lane.b32.xlu1 %v294_v25, %s1962_s5  ;;  %330 = vst.msk [vmem:[#allocation3 + $0x28] sm:$0xf] %vm188_vm1, %v294_v25  ;;  %373 = vrot.lane.b32.xlu0 %v292_v26, %s1962_s5  ;;  %v293_v28 = vld [vmem:[#allocation2 + $0x20] sm:$0xff]  ;;  %v2215_v30 = vld [vmem:[#allocation2 + $0x38] sm:$0xff]  ;;  %v2222_v31 = vld [vmem:[#allocation2 + $0x50] sm:$0xff]  ;;  %s1964_s8 = smov 12  }
  0x39   : > { %328 = vst.msk [vmem:[#allocation3 + $0x18] sm:$0xff] %vm185_vm0, %v292_v26  ;;  %331 = vst.msk [vmem:[#allocation3 + $0x30] sm:$0xff] %vm185_vm0, %v2204_v27  ;;  %v2213_v29 = vld [vmem:[#allocation2 + $0x40] sm:$0xf]  ;;  %v2224_v32 = vld [vmem:[#allocation2 + $0x48] sm:$0xff]  ;;  %s1965_s9 = smov 16  }
  0x3a   : > { %329 = vst.msk [vmem:[#allocation3 + $0x20] sm:$0xff] %vm185_vm0, %v293_v28  ;;  %332 = vst.msk [vmem:[#allocation3 + $0x38] sm:$0xff] %vm185_vm0, %v2215_v30  ;;  %v2226_v33 = vld [vmem:[#allocation2 + $0x60] sm:$0xff]  ;;  %v2234_v34 = vld [vmem:[#allocation2 + $0x58] sm:$0xf]  ;;  %vm448_vm2 = vcmask 60448  }
  0x3b   : > { %333 = vst.msk [vmem:[#allocation3 + $0x40] sm:$0xf] %vm188_vm1, %v2213_v29  ;;  %v2236_v35 = vld [vmem:[#allocation2 + $0x70] sm:$0xf]  ;;  %336 = vst.msk [vmem:[#allocation3 + $0x58] sm:$0xf] %vm188_vm1, %v2234_v34 }
  0x3c   : > { %335 = vst.msk [vmem:[#allocation3 + $0x50] sm:$0xff] %vm185_vm0, %v2222_v31  ;;  %334 = vst.msk [vmem:[#allocation3 + $0x48] sm:$0xff] %vm185_vm0, %v2224_v32  ;;  %v2242_v36 = vld [vmem:[#allocation2 + $0x68] sm:$0xff]  ;;  %v2244_v37 = vld [vmem:[#allocation2 + $0x78] sm:$0xff]  ;;  %474 = vrot.lane.b32.xlu1 %v2204_v27, %s1963_s7  ;;  %375 = vrot.lane.b32.xlu0 %v293_v28, %s1962_s5  ;;  %vm445_vm3 = vcmask 64544   ;;  %vm546_vm4 = vcmask 97344  }
  0x3d   : > { %337 = vst.msk [vmem:[#allocation3 + $0x60] sm:$0xff] %vm185_vm0, %v2226_v33  ;;  %v2246_v38 = vld [vmem:[#allocation2 + $0x88] sm:$0xf]  ;;  %338 = vst.msk [vmem:[#allocation3 + $0x68] sm:$0xff] %vm185_vm0, %v2242_v36  ;;  %v2257_v39 = vld [vmem:[#allocation2 + $0x80] sm:$0xff]  ;;  %vm549_vm5 = vcmask 93248  }
  0x3e   : > { %339 = vst.msk [vmem:[#allocation3 + $0x70] sm:$0xf] %vm188_vm1, %v2236_v35  ;;  %342 = vst.msk [vmem:[#allocation3 + $0x88] sm:$0xf] %vm188_vm1, %v2246_v38  ;;  %v2259_v40 = vld [vmem:[#allocation2 + $0x90] sm:$0xff]  ;;  %v2269_v42 = vld [vmem:[#allocation2 + $0x98] sm:$0xff] }
  0x3f   : > { %340 = vst.msk [vmem:[#allocation3 + $0x78] sm:$0xff] %vm185_vm0, %v2244_v37  ;;  %v2261_v41 = vld [vmem:[#allocation2 + $0xa0] sm:$0xf]  ;;  %341 = vst.msk [vmem:[#allocation3 + $0x80] sm:$0xff] %vm185_vm0, %v2257_v39  ;;  %v2271_v43 = vld [vmem:[#allocation2 + $0xa8] sm:$0xff]  ;;  %vm647_vm6 = vcmask 130144  }
  0x40   : > { %343 = vst.msk [vmem:[#allocation3 + $0x90] sm:$0xff] %vm185_vm0, %v2259_v40  ;;  %v2273_v44 = vld [vmem:[#allocation2 + $0xb8] sm:$0xf]  ;;  %344 = vst.msk [vmem:[#allocation3 + $0x98] sm:$0xff] %vm185_vm0, %v2269_v42  ;;  %v2281_v45 = vld [vmem:[#allocation2 + $0xb0] sm:$0xff]  ;;  %478 = vrot.lane.b32.xlu1 %v2213_v29, %s1963_s7  ;;  %476 = vrot.lane.b32.xlu0 %v2215_v30, %s1963_s7  ;;  %vm748_vm7 = vcmask 162944  }
  0x41   : > { %345 = vst.msk [vmem:[#allocation3 + $0xa0] sm:$0xf] %vm188_vm1, %v2261_v41  ;;  %348 = vst.msk [vmem:[#allocation3 + $0xb8] sm:$0xf] %vm188_vm1, %v2273_v44  ;;  %v291_v46 = vld [vmem:[#allocation2 + $0x10] sm:$0xf] }
  0x42   : > { %346 = vst.msk [vmem:[#allocation3 + $0xa8] sm:$0xff] %vm185_vm0, %v2271_v43  ;;  %347 = vst.msk [vmem:[#allocation3 + $0xb0] sm:$0xff] %vm185_vm0, %v2281_v45  ;;  %v289_v47 = vld [vmem:[#allocation2] sm:$0xff]  ;;  %v290_v48 = vld [vmem:[#allocation2 + $0x8] sm:$0xff]  ;;  %vm650_vm8 = vcmask 126048   ;;  %vm751_vm9 = vcmask 158848  }
  0x43   : > { %327 = vst.msk [vmem:[#allocation3 + $0x10] sm:$0xf] %vm188_vm1, %v291_v46  ;;  %v2392_v49 = vld [vmem:[#allocation2 + $0xc0] sm:$0xff]  ;;  %v2398_v50 = vld [vmem:[#allocation2 + $0xd0] sm:$0xf]  ;;  %v2400_v51 = vld [vmem:[#allocation2 + $0xc8] sm:$0xff] }
  0x44   : > { %325 = vst.msk [vmem:[#allocation3] sm:$0xff] %vm185_vm0, %v289_v47  ;;  %326 = vst.msk [vmem:[#allocation3 + $0x8] sm:$0xff] %vm185_vm0, %v290_v48  ;;  %577 = vrot.lane.b32.xlu1 %v2222_v31, %s1964_s8  ;;  %575 = vrot.lane.b32.xlu0 %v2224_v32, %s1964_s8  ;;  %v2432_v62 = vld [vmem:[#allocation2 + $0xd8] sm:$0xff]  ;;  %vm798_vm10 = vcmask 162816   ;;  %v2440_v2 = vld [vmem:[#allocation2 + $0xe8] sm:$0xf] }
  0x45   : > { %v2442_v3 = vld [vmem:[#allocation2 + $0xe0] sm:$0xff]  ;;  %v319_v16 = vld [vmem:[#allocation2 + $0xf0] sm:$0xff]  ;;  %v320_v20 = vld [vmem:[#allocation2 + $0xf8] sm:$0xff]  ;;  %vm839_vm11 = vcmask 1046528   ;;  %s1966_s10 = smov 20   ;;  %vm945_vm12 = vcmask 1045504  }
  0x46   : > { %v321_v19 = vld [vmem:[#allocation2 + $0x100] sm:$0xf]  ;;  %s1967_s11 = smov 40   ;;  %vm1051_vm13 = vcmask 1044480   ;;  %s1968_s20 = smov 60   ;;  %vm1157_vm14 = vcmask 1043456   ;;  %vm2736_vm15 = vmpackc.low %vm185_vm0, %vm185_vm0 }
  0x47   : > { %s1969_s21 = smov 80   ;;  %vm928_vm1 = vcmask 326816   ;;  %s1973_s27 = smov [#allocation5]  }
  0x48   : > { %676 = vrot.lane.b32.xlu1 %v2226_v33, %s1965_s9  ;;  %579 = vrot.lane.b32.xlu0 %v2234_v34, %s1964_s8  ;;  %s1869_s28 = sshll.u32 %s1973_s27, 4  ;;  %s1870_s28 = int_to_ptr.vmem [resolvable:$false] %s1869_s28 }
  0x49   : > { %s1871_s29 = scalar_lea.vmem %s1870_s28, 128 }
  0x4c   : > { %680 = vrot.lane.b32.xlu1 %v2236_v35, %s1965_s9  ;;  %678 = vrot.lane.b32.xlu0 %v2242_v36, %s1965_s9 }
  0x50   : > { %381 = vrot.lane.b32.xlu1 %v2215_v30, %s1962_s5  ;;  %379 = vrot.lane.b32.xlu0 %v2204_v27, %s1962_s5 }
  0x54   : > { %480 = vrot.lane.b32.xlu1 %v2224_v32, %s1963_s7  ;;  %383 = vrot.lane.b32.xlu0 %v2213_v29, %s1962_s5 }
  0x58   : > { %484 = vrot.lane.b32.xlu1 %v2234_v34, %s1963_s7  ;;  %482 = vrot.lane.b32.xlu0 %v2222_v31, %s1963_s7 }
  0x5c   : > { %583 = vrot.lane.b32.xlu1 %v2242_v36, %s1964_s8  ;;  %581 = vrot.lane.b32.xlu0 %v2226_v33, %s1964_s8 }
  0x60   : > { %682 = vrot.lane.b32.xlu1 %v2244_v37, %s1965_s9  ;;  %585 = vrot.lane.b32.xlu0 %v2236_v35, %s1964_s8 }
  0x64   : > { %686 = vrot.lane.b32.xlu1 %v2246_v38, %s1965_s9  ;;  %684 = vrot.lane.b32.xlu0 %v2257_v39, %s1965_s9 }
  0x68   : > { %387 = vrot.lane.b32.xlu1 %v2222_v31, %s1962_s5  ;;  %385 = vrot.lane.b32.xlu0 %v2224_v32, %s1962_s5 }
  0x6c   : > { %486 = vrot.lane.b32.xlu1 %v2226_v33, %s1963_s7  ;;  %389 = vrot.lane.b32.xlu0 %v2234_v34, %s1962_s5 }
  0x70   : > { %490 = vrot.lane.b32.xlu1 %v2236_v35, %s1963_s7  ;;  %488 = vrot.lane.b32.xlu0 %v2242_v36, %s1963_s7 }
  0x74   : > { %589 = vrot.lane.b32.xlu1 %v2257_v39, %s1964_s8  ;;  %587 = vrot.lane.b32.xlu0 %v2244_v37, %s1964_s8 }
  0x78   : > { %688 = vrot.lane.b32.xlu1 %v2259_v40, %s1965_s9  ;;  %591 = vrot.lane.b32.xlu0 %v2246_v38, %s1964_s8 }
  0x7c   : > { %692 = vrot.lane.b32.xlu1 %v2261_v41, %s1965_s9  ;;  %690 = vrot.lane.b32.xlu0 %v2269_v42, %s1965_s9 }
  0x80   : > { %393 = vrot.lane.b32.xlu1 %v2242_v36, %s1962_s5  ;;  %391 = vrot.lane.b32.xlu0 %v2226_v33, %s1962_s5 }
  0x84   : > { %492 = vrot.lane.b32.xlu1 %v2244_v37, %s1963_s7  ;;  %395 = vrot.lane.b32.xlu0 %v2236_v35, %s1962_s5 }
  0x88   : > { %496 = vrot.lane.b32.xlu1 %v2246_v38, %s1963_s7  ;;  %494 = vrot.lane.b32.xlu0 %v2257_v39, %s1963_s7 }
  0x8c   : > { %595 = vrot.lane.b32.xlu1 %v2269_v42, %s1964_s8  ;;  %593 = vrot.lane.b32.xlu0 %v2259_v40, %s1964_s8 }
  0x90   : > { %694 = vrot.lane.b32.xlu1 %v2271_v43, %s1965_s9  ;;  %597 = vrot.lane.b32.xlu0 %v2261_v41, %s1964_s8 }
  0x94   : > { %698 = vrot.lane.b32.xlu1 %v2273_v44, %s1965_s9  ;;  %696 = vrot.lane.b32.xlu0 %v2281_v45, %s1965_s9 }
  0x98   : > { %399 = vrot.lane.b32.xlu1 %v2257_v39, %s1962_s5  ;;  %397 = vrot.lane.b32.xlu0 %v2244_v37, %s1962_s5 }
  0x9c   : > { %498 = vrot.lane.b32.xlu1 %v2259_v40, %s1963_s7  ;;  %401 = vrot.lane.b32.xlu0 %v2246_v38, %s1962_s5 }
  0xa0   : > { %502 = vrot.lane.b32.xlu1 %v2261_v41, %s1963_s7  ;;  %500 = vrot.lane.b32.xlu0 %v2269_v42, %s1963_s7 }
  0xa4   : > { %601 = vrot.lane.b32.xlu1 %v2281_v45, %s1964_s8  ;;  %599 = vrot.lane.b32.xlu0 %v2271_v43, %s1964_s8 }
  0xa8   : > { %700 = vrot.lane.b32.xlu1 %v2392_v49, %s1965_s9  ;;  %603 = vrot.lane.b32.xlu0 %v2273_v44, %s1964_s8 }
  0xaa   : > { %v378_v52 = vpop.permute.xlu1 %377  ;;  %v374_v53 = vpop.permute.xlu0 %373 }
  0xab   : > { %449 = vst.msk [vmem:[#allocation3 + $0x10] sm:$0xf] %vm448_vm2, %v378_v52 }
  0xac   : > { %446 = vst.msk [vmem:[#allocation3] sm:$0xff] %vm445_vm3, %v374_v53  ;;  %704 = vrot.lane.b32.xlu1 %v2398_v50, %s1965_s9  ;;  %702 = vrot.lane.b32.xlu0 %v2400_v51, %s1965_s9 }
  0xae   : > { %v475_v54 = vpop.permute.xlu1 %474  ;;  %v376_v55 = vpop.permute.xlu0 %375 }
  0xaf   : > { %547 = vst.msk [vmem:[#allocation3] sm:$0xff] %vm546_vm4, %v475_v54 }
  0xb0   : > { %447 = vst.msk [vmem:[#allocation3 + $0x8] sm:$0xff] %vm445_vm3, %v376_v55  ;;  %405 = vrot.lane.b32.xlu1 %v2269_v42, %s1962_s5  ;;  %403 = vrot.lane.b32.xlu0 %v2259_v40, %s1962_s5  ;;  %v324_v55 = vld [vmem:[#allocation2 + $0x118] sm:$0xf] }
  0xb2   : > { %v479_v56 = vpop.permute.xlu1 %478  ;;  %v477_v57 = vpop.permute.xlu0 %476 }
  0xb3   : > { %550 = vst.msk [vmem:[#allocation3 + $0x10] sm:$0xf] %vm549_vm5, %v479_v56  ;;  %v323_v56 = vld [vmem:[#allocation2 + $0x110] sm:$0xff] }
  0xb4   : > { %548 = vst.msk [vmem:[#allocation3 + $0x8] sm:$0xff] %vm546_vm4, %v477_v57  ;;  %504 = vrot.lane.b32.xlu1 %v2271_v43, %s1963_s7  ;;  %407 = vrot.lane.b32.xlu0 %v2261_v41, %s1962_s5 }
  0xb6   : > { %v578_v58 = vpop.permute.xlu1 %577  ;;  %v576_v59 = vpop.permute.xlu0 %575 }
  0xb7   : > { %649 = vst.msk [vmem:[#allocation3 + $0x8] sm:$0xff] %vm647_vm6, %v578_v58  ;;  %648 = vst.msk [vmem:[#allocation3] sm:$0xff] %vm647_vm6, %v576_v59 }
  0xb8   : > { %508 = vrot.lane.b32.xlu1 %v2273_v44, %s1963_s7  ;;  %506 = vrot.lane.b32.xlu0 %v2281_v45, %s1963_s7 }
  0xba   : > { %v677_v60 = vpop.permute.xlu1 %676  ;;  %v580_v61 = vpop.permute.xlu0 %579 }
  0xbb   : > { %749 = vst.msk [vmem:[#allocation3] sm:$0xff] %vm748_vm7, %v677_v60 }
  0xbc   : > { %651 = vst.msk [vmem:[#allocation3 + $0x10] sm:$0xf] %vm650_vm8, %v580_v61  ;;  %607 = vrot.lane.b32.xlu1 %v2400_v51, %s1964_s8  ;;  %605 = vrot.lane.b32.xlu0 %v2392_v49, %s1964_s8 }
  0xbe   : > { %v681_v63 = vpop.permute.xlu1 %680  ;;  %v679_v1 = vpop.permute.xlu0 %678 }
  0xbf   : > { %752 = vst.msk [vmem:[#allocation3 + $0x10] sm:$0xf] %vm751_vm9, %v681_v63 }
  0xc0   : > { %750 = vst.msk [vmem:[#allocation3 + $0x8] sm:$0xff] %vm748_vm7, %v679_v1  ;;  %706 = vrot.lane.b32.xlu1 %v2432_v62, %s1965_s9  ;;  %609 = vrot.lane.b32.xlu0 %v2398_v50, %s1964_s8 }
  0xc2   : > { %v382_v4 = vpop.permute.xlu1 %381  ;;  %v380_v5 = vpop.permute.xlu0 %379  ;;  %v2444_v6 = vld [vmem:[#allocation3] sm:$0xff] }
  0xc3   : > { %451 = vst.msk [vmem:[#allocation3 + $0x20] sm:$0xff] %vm445_vm3, %v382_v4  ;;  %450 = vst.msk [vmem:[#allocation3 + $0x18] sm:$0xff] %vm445_vm3, %v380_v5 }
  0xc4   : > { %799 = vst.msk [vmem:[#allocation4] sm:$0xff] %vm798_vm10, %v2444_v6  ;;  %710 = vrot.lane.b32.xlu1 %v2440_v2, %s1965_s9  ;;  %708 = vrot.lane.b32.xlu0 %v2442_v3, %s1965_s9 }
  0xc6   : > { %v481_v7 = vpop.permute.xlu1 %480  ;;  %v384_v8 = vpop.permute.xlu0 %383  ;;  %v2525_v54 = vld [vmem:[#allocation3 + $0x10] sm:$0xf] }
  0xc7   : > { %v2454_v9 = vld [vmem:[#allocation3 + $0x8] sm:$0xff]  ;;  %551 = vst.msk [vmem:[#allocation3 + $0x18] sm:$0xff] %vm546_vm4, %v481_v7  ;;  %v843_v61 = vrot.slane %v2525_v54, 1  ;;  %v949_v7 = vrot.slane %v2525_v54, 2 }
  0xc8   : > { %452 = vst.msk [vmem:[#allocation3 + $0x28] sm:$0xf] %vm448_vm2, %v384_v8  ;;  %411 = vrot.lane.b32.xlu1 %v2281_v45, %s1962_s5  ;;  %409 = vrot.lane.b32.xlu0 %v2271_v43, %s1962_s5  ;;  %v841_v60 = vrot.slane %v2454_v9, 1  ;;  %v947_v5 = vrot.slane %v2454_v9, 2  ;;  %v946_v8 = vrot.slane %v2444_v6, 2 }
  0xc9   : > { %800 = vst.msk [vmem:[#allocation4 + $0x8] sm:$0xff] %vm798_vm10, %v2454_v9 }
  0xca   : > { %v485_v10 = vpop.permute.xlu1 %484  ;;  %v483_v11 = vpop.permute.xlu0 %482 }
  0xcb   : > { %553 = vst.msk [vmem:[#allocation3 + $0x28] sm:$0xf] %vm549_vm5, %v485_v10 }
  0xcc   : > { %552 = vst.msk [vmem:[#allocation3 + $0x20] sm:$0xff] %vm546_vm4, %v483_v11  ;;  %510 = vrot.lane.b32.xlu1 %v2392_v49, %s1963_s7  ;;  %413 = vrot.lane.b32.xlu0 %v2273_v44, %s1962_s5 }
  0xce   : > { %v584_v12 = vpop.permute.xlu1 %583  ;;  %v582_v13 = vpop.permute.xlu0 %581 }
  0xcf   : > { %653 = vst.msk [vmem:[#allocation3 + $0x20] sm:$0xff] %vm647_vm6, %v584_v12  ;;  %652 = vst.msk [vmem:[#allocation3 + $0x18] sm:$0xff] %vm647_vm6, %v582_v13  ;;  %v950_v12 = vsel %vm945_vm12, %v947_v5, %v949_v7  ;;  %v948_v13 = vsel %vm945_vm12, %v946_v8, %v947_v5 }
  0xd0   : > { %514 = vrot.lane.b32.xlu1 %v2398_v50, %s1963_s7  ;;  %512 = vrot.lane.b32.xlu0 %v2400_v51, %s1963_s7 }
  0xd2   : > { %v683_v14 = vpop.permute.xlu1 %682  ;;  %v586_v15 = vpop.permute.xlu0 %585 }
  0xd3   : > { %753 = vst.msk [vmem:[#allocation3 + $0x18] sm:$0xff] %vm748_vm7, %v683_v14  ;;  %v1053_v14 = vrot.slane %v2454_v9, 3 }
  0xd4   : > { %654 = vst.msk [vmem:[#allocation3 + $0x28] sm:$0xf] %vm650_vm8, %v586_v15  ;;  %613 = vrot.lane.b32.xlu1 %v2442_v3, %s1964_s8  ;;  %611 = vrot.lane.b32.xlu0 %v2432_v62, %s1964_s8  ;;  %v1055_v15 = vrot.slane %v2525_v54, 3 }
  0xd6   : > { %v687_v17 = vpop.permute.xlu1 %686  ;;  %v685_v18 = vpop.permute.xlu0 %684 }
  0xd7   : > { %755 = vst.msk [vmem:[#allocation3 + $0x28] sm:$0xf] %vm751_vm9, %v687_v17 }
  0xd8   : > { %754 = vst.msk [vmem:[#allocation3 + $0x20] sm:$0xff] %vm748_vm7, %v685_v18  ;;  %712 = vrot.lane.b32.xlu1 %v319_v16, %s1965_s9  ;;  %615 = vrot.lane.b32.xlu0 %v2440_v2, %s1964_s8 }
  0xda   : > { %v388_v21 = vpop.permute.xlu1 %387  ;;  %v386_v22 = vpop.permute.xlu0 %385  ;;  %v2487_v23 = vld [vmem:[#allocation3 + $0x18] sm:$0xff] }
  0xdb   : > { %454 = vst.msk [vmem:[#allocation3 + $0x38] sm:$0xff] %vm445_vm3, %v388_v21  ;;  %453 = vst.msk [vmem:[#allocation3 + $0x30] sm:$0xff] %vm445_vm3, %v386_v22  ;;  %v1159_v21 = vrot.slane %v2454_v9, 4  ;;  %v1161_v22 = vrot.slane %v2525_v54, 4 }
  0xdc   : > { %801 = vst.msk [vmem:[#allocation4 + $0x10] sm:$0xff] %vm798_vm10, %v2487_v23  ;;  %716 = vrot.lane.b32.xlu1 %v321_v19, %s1965_s9  ;;  %714 = vrot.lane.b32.xlu0 %v320_v20, %s1965_s9 }
  0xde   : > { %v487_v24 = vpop.permute.xlu1 %486  ;;  %v390_v25 = vpop.permute.xlu0 %389 }
  0xdf   : > { %v2495_v26 = vld [vmem:[#allocation3 + $0x20] sm:$0xff]  ;;  %554 = vst.msk [vmem:[#allocation3 + $0x30] sm:$0xff] %vm546_vm4, %v487_v24  ;;  %v779_v24 = vld [vmem:[#allocation3 + $0x28] sm:$0xf] }
  0xe0   : > { %455 = vst.msk [vmem:[#allocation3 + $0x40] sm:$0xf] %vm448_vm2, %v390_v25  ;;  %417 = vrot.lane.b32.xlu1 %v2400_v51, %s1962_s5  ;;  %415 = vrot.lane.b32.xlu0 %v2392_v49, %s1962_s5  ;;  %v1158_v25 = vrot.slane %v2444_v6, 4  ;;  %v952_v54 = vrot.slane %v2495_v26, 2 }
  0xe1   : > { %802 = vst.msk [vmem:[#allocation4 + $0x18] sm:$0xff] %vm798_vm10, %v2495_v26 }
  0xe2   : > { %v491_v28 = vpop.permute.xlu1 %490  ;;  %v489_v46 = vpop.permute.xlu0 %488  ;;  %v1160_v9 = vsel %vm1157_vm14, %v1158_v25, %v1159_v21 }
  0xe3   : > { %556 = vst.msk [vmem:[#allocation3 + $0x40] sm:$0xf] %vm549_vm5, %v491_v28 }
  0xe4   : > { %555 = vst.msk [vmem:[#allocation3 + $0x38] sm:$0xff] %vm546_vm4, %v489_v46  ;;  %516 = vrot.lane.b32.xlu1 %v2432_v62, %s1963_s7  ;;  %419 = vrot.lane.b32.xlu0 %v2398_v50, %s1962_s5  ;;  %v322_v50 = vld [vmem:[#allocation2 + $0x108] sm:$0xff]  ;;  %v840_v62 = vrot.slane %v2444_v6, 1 }
  0xe6   : > { %v590_v47 = vpop.permute.xlu1 %589  ;;  %v588_v48 = vpop.permute.xlu0 %587  ;;  %v842_v4 = vsel %vm839_vm11, %v840_v62, %v841_v60 }
  0xe7   : > { %656 = vst.msk [vmem:[#allocation3 + $0x38] sm:$0xff] %vm647_vm6, %v590_v47  ;;  %655 = vst.msk [vmem:[#allocation3 + $0x30] sm:$0xff] %vm647_vm6, %v588_v48  ;;  %v1162_v47 = vsel %vm1157_vm14, %v1159_v21, %v1161_v22  ;;  %v846_v48 = vrot.slane %v2495_v26, 1 }
  0xe8   : > { %520 = vrot.lane.b32.xlu1 %v2440_v2, %s1963_s7  ;;  %518 = vrot.lane.b32.xlu0 %v2442_v3, %s1963_s7  ;;  %v844_v3 = vsel %vm839_vm11, %v841_v60, %v843_v61  ;;  %s1655_s7 = sshll.u32 %s1947_s16, 1 }
  0xea   : > { %v689_v49 = vpop.permute.xlu1 %688  ;;  %v592_v51 = vpop.permute.xlu0 %591 }
  0xeb   : > { %756 = vst.msk [vmem:[#allocation3 + $0x30] sm:$0xff] %vm748_vm7, %v689_v49  ;;  %v848_v49 = vrot.slane %v779_v24, 1 }
  0xec   : > { %657 = vst.msk [vmem:[#allocation3 + $0x40] sm:$0xf] %vm650_vm8, %v592_v51  ;;  %619 = vrot.lane.b32.xlu1 %v320_v20, %s1964_s8  ;;  %617 = vrot.lane.b32.xlu0 %v319_v16, %s1964_s8  ;;  %v1052_v16 = vrot.slane %v2444_v6, 3  ;;  %v845_v6 = vrot.slane %v2487_v23, 1 }
  0xee   : > { %v693_v52 = vpop.permute.xlu1 %692  ;;  %v691_v53 = vpop.permute.xlu0 %690  ;;  %v1054_v20 = vsel %vm1051_vm13, %v1052_v16, %v1053_v14 }
  0xef   : > { %758 = vst.msk [vmem:[#allocation3 + $0x40] sm:$0xf] %vm751_vm9, %v693_v52  ;;  %v849_v52 = vsel %vm839_vm11, %v846_v48, %v848_v49 }
  0xf0   : > { %757 = vst.msk [vmem:[#allocation3 + $0x38] sm:$0xff] %vm748_vm7, %v691_v53  ;;  %718 = vrot.lane.b32.xlu1 %v322_v50, %s1965_s9  ;;  %621 = vrot.lane.b32.xlu0 %v321_v19, %s1964_s8  ;;  %v1056_v19 = vsel %vm1051_vm13, %v1053_v14, %v1055_v15  ;;  %v847_v53 = vsel %vm839_vm11, %v845_v6, %v846_v48  ;;  %v1163_v14 = vrot.slane %v2487_v23, 4  ;;  %s1531_s8 = sadd.s32 %s1943_s15, %s1655_s7  ;;  %s1520_s15 = scalar_lea.sflag [#allocation6], %s175_s4 }
  0xf2   : > { %v394_v57 = vpop.permute.xlu1 %393  ;;  %v392_v58 = vpop.permute.xlu0 %391  ;;  %v2527_v59 = vld [vmem:[#allocation3 + $0x30] sm:$0xff] }
  0xf3   : > { %457 = vst.msk [vmem:[#allocation3 + $0x50] sm:$0xff] %vm445_vm3, %v394_v57  ;;  %456 = vst.msk [vmem:[#allocation3 + $0x48] sm:$0xff] %vm445_vm3, %v392_v58 }
  0xf4   : > { %803 = vst.msk [vmem:[#allocation4 + $0x20] sm:$0xff] %vm798_vm10, %v2527_v59  ;;  %722 = vrot.lane.b32.xlu1 %v324_v55, %s1965_s9  ;;  %720 = vrot.lane.b32.xlu0 %v323_v56, %s1965_s9  ;;  %v954_v55 = vrot.slane %v779_v24, 2  ;;  %v951_v56 = vrot.slane %v2487_v23, 2  ;;  %s1656_s9 = sshll.u32 %s1531_s8, 6 }
  0xf5   : > { %s2993_s16 = scalar_lea.hbm %s3053_s3, %s1656_s9 }
  0xf6   : > { %v493_v63 = vpop.permute.xlu1 %492  ;;  %v396_v1 = vpop.permute.xlu0 %395  ;;  %v955_v61 = vsel %vm945_vm12, %v952_v54, %v954_v55  ;;  %v953_v62 = vsel %vm945_vm12, %v951_v56, %v952_v54 }
  0xf7   : > { %v2538_v2 = vld [vmem:[#allocation3 + $0x38] sm:$0xff]  ;;  %557 = vst.msk [vmem:[#allocation3 + $0x48] sm:$0xff] %vm546_vm4, %v493_v63  ;;  %v1058_v63 = vrot.slane %v2495_v26, 3 }
  0xf8   : > { %458 = vst.msk [vmem:[#allocation3 + $0x58] sm:$0xf] %vm448_vm2, %v396_v1  ;;  %882 = vrot.lane.b32.xlu1 %v844_v3, %s1966_s10  ;;  %880 = vrot.lane.b32.xlu0 %v842_v4, %s1966_s10  ;;  %v1060_v1 = vrot.slane %v779_v24, 3  ;;  %v1057_v3 = vrot.slane %v2487_v23, 3  ;;  %v957_v25 = vrot.slane %v2538_v2, 2  ;;  %v1063_v6 = vrot.slane %v2538_v2, 3 }
  0xf9   : > { %804 = vst.msk [vmem:[#allocation4 + $0x28] sm:$0xff] %vm798_vm10, %v2538_v2  ;;  %v1169_v56 = vrot.slane %v2538_v2, 4 }
  0xfa   : > { %v497_v10 = vpop.permute.xlu1 %496  ;;  %v495_v11 = vpop.permute.xlu0 %494  ;;  %v1061_v8 = vsel %vm1051_vm13, %v1058_v63, %v1060_v1 }
  0xfb   : > { %559 = vst.msk [vmem:[#allocation3 + $0x58] sm:$0xf] %vm549_vm5, %v497_v10  ;;  %v1059_v10 = vsel %vm1051_vm13, %v1057_v3, %v1058_v63 }
  0xfc   : > { %558 = vst.msk [vmem:[#allocation3 + $0x50] sm:$0xff] %vm546_vm4, %v495_v11  ;;  %988 = vrot.lane.b32.xlu1 %v950_v12, %s1967_s11  ;;  %986 = vrot.lane.b32.xlu0 %v948_v13, %s1967_s11  ;;  %v1164_v11 = vrot.slane %v2495_v26, 4  ;;  %v1166_v12 = vrot.slane %v779_v24, 4  ;;  %v782_v13 = vld [vmem:[#allocation3 + $0x40] sm:$0xf] }
  0xfe   : > { %v596_v17 = vpop.permute.xlu1 %595  ;;  %v594_v18 = vpop.permute.xlu0 %593  ;;  %v1165_v26 = vsel %vm1157_vm14, %v1163_v14, %v1164_v11 }
  0xff   : > { %659 = vst.msk [vmem:[#allocation3 + $0x50] sm:$0xff] %vm647_vm6, %v596_v17  ;;  %658 = vst.msk [vmem:[#allocation3 + $0x48] sm:$0xff] %vm647_vm6, %v594_v18  ;;  %v1167_v17 = vsel %vm1157_vm14, %v1164_v11, %v1166_v12  ;;  %v851_v18 = vrot.slane %v2538_v2, 1 }
 0x100   : > { %1094 = vrot.lane.b32.xlu1 %v1056_v19, %s1968_s20  ;;  %1092 = vrot.lane.b32.xlu0 %v1054_v20, %s1968_s20  ;;  %v853_v19 = vrot.slane %v782_v13, 1  ;;  %v850_v20 = vrot.slane %v2527_v59, 1 }
 0x102   : > { %v695_v28 = vpop.permute.xlu1 %694  ;;  %v598_v46 = vpop.permute.xlu0 %597  ;;  %v854_v22 = vsel %vm839_vm11, %v851_v18, %v853_v19  ;;  %v852_v24 = vsel %vm839_vm11, %v850_v20, %v851_v18 }
 0x103   : > { %759 = vst.msk [vmem:[#allocation3 + $0x48] sm:$0xff] %vm748_vm7, %v695_v28  ;;  %v959_v28 = vrot.slane %v782_v13, 2 }
 0x104   : > { %660 = vst.msk [vmem:[#allocation3 + $0x58] sm:$0xf] %vm650_vm8, %v598_v46  ;;  %1200 = vrot.lane.b32.xlu1 %v1162_v47, %s1969_s21  ;;  %1198 = vrot.lane.b32.xlu0 %v1160_v9, %s1969_s21  ;;  %v956_v46 = vrot.slane %v2527_v59, 2 }
 0x105   : > { %v960_v48 = vsel %vm945_vm12, %v957_v25, %v959_v28 }
 0x106   : > { %v699_v51 = vpop.permute.xlu1 %698  ;;  %v697_v50 = vpop.permute.xlu0 %696  ;;  %v958_v49 = vsel %vm945_vm12, %v956_v46, %v957_v25 }
 0x107   : > { %761 = vst.msk [vmem:[#allocation3 + $0x58] sm:$0xf] %vm751_vm9, %v699_v51  ;;  %v1065_v51 = vrot.slane %v782_v13, 3 }
 0x108   : > { %760 = vst.msk [vmem:[#allocation3 + $0x50] sm:$0xff] %vm748_vm7, %v697_v50  ;;  %886 = vrot.lane.b32.xlu1 %v849_v52, %s1966_s10  ;;  %884 = vrot.lane.b32.xlu0 %v847_v53, %s1966_s10  ;;  %v1062_v50 = vrot.slane %v2527_v59, 3 }
 0x109   : > { %v1066_v54 = vsel %vm1051_vm13, %v1063_v6, %v1065_v51 }
 0x10a   : > { %v400_v57 = vpop.permute.xlu1 %399  ;;  %v398_v58 = vpop.permute.xlu0 %397  ;;  %v2585_v60 = vld [vmem:[#allocation3 + $0x48] sm:$0xff]  ;;  %v1064_v55 = vsel %vm1051_vm13, %v1062_v50, %v1063_v6 }
 0x10b   : > { %460 = vst.msk [vmem:[#allocation3 + $0x68] sm:$0xff] %vm445_vm3, %v400_v57  ;;  %459 = vst.msk [vmem:[#allocation3 + $0x60] sm:$0xff] %vm445_vm3, %v398_v58  ;;  %v1171_v57 = vrot.slane %v782_v13, 4 }
 0x10c   : > { %805 = vst.msk [vmem:[#allocation4 + $0x30] sm:$0xff] %vm798_vm10, %v2585_v60  ;;  %992 = vrot.lane.b32.xlu1 %v955_v61, %s1967_s11  ;;  %990 = vrot.lane.b32.xlu0 %v953_v62, %s1967_s11  ;;  %v1168_v61 = vrot.slane %v2527_v59, 4  ;;  %v855_v59 = vrot.slane %v2585_v60, 1 }
 0x10d   : > { %v1172_v3 = vsel %vm1157_vm14, %v1169_v56, %v1171_v57 }
 0x10e   : > { %v499_v4 = vpop.permute.xlu1 %498  ;;  %v402_v5 = vpop.permute.xlu0 %401  ;;  %v785_v58 = vld [vmem:[#allocation3 + $0x58] sm:$0xf]  ;;  %v1170_v2 = vsel %vm1157_vm14, %v1168_v61, %v1169_v56 }
 0x10f   : > { %v2597_v7 = vld [vmem:[#allocation3 + $0x50] sm:$0xff]  ;;  %560 = vst.msk [vmem:[#allocation3 + $0x60] sm:$0xff] %vm546_vm4, %v499_v4 }
 0x110   : > { %461 = vst.msk [vmem:[#allocation3 + $0x70] sm:$0xf] %vm448_vm2, %v402_v5  ;;  %1098 = vrot.lane.b32.xlu1 %v1061_v8, %s1968_s20  ;;  %1096 = vrot.lane.b32.xlu0 %v1059_v10, %s1968_s20  ;;  %v856_v4 = vrot.slane %v2597_v7, 1  ;;  %v858_v5 = vrot.slane %v785_v58, 1  ;;  %v962_v14 = vrot.slane %v2597_v7, 2  ;;  %v1068_v20 = vrot.slane %v2597_v7, 3 }
 0x111   : > { %806 = vst.msk [vmem:[#allocation4 + $0x38] sm:$0xff] %vm798_vm10, %v2597_v7  ;;  %v1174_v46 = vrot.slane %v2597_v7, 4 }
 0x112   : > { %v503_v15 = vpop.permute.xlu1 %502  ;;  %v501_v16 = vpop.permute.xlu0 %500  ;;  %v859_v12 = vsel %vm839_vm11, %v856_v4, %v858_v5  ;;  %v857_v13 = vsel %vm839_vm11, %v855_v59, %v856_v4 }
 0x113   : > { %562 = vst.msk [vmem:[#allocation3 + $0x70] sm:$0xf] %vm549_vm5, %v503_v15  ;;  %v964_v15 = vrot.slane %v785_v58, 2 }
 0x114   : > { %561 = vst.msk [vmem:[#allocation3 + $0x68] sm:$0xff] %vm546_vm4, %v501_v16  ;;  %1204 = vrot.lane.b32.xlu1 %v1167_v17, %s1969_s21  ;;  %1202 = vrot.lane.b32.xlu0 %v1165_v26, %s1969_s21  ;;  %v961_v16 = vrot.slane %v2585_v60, 2 }
 0x115   : > { %v965_v18 = vsel %vm945_vm12, %v962_v14, %v964_v15 }
 0x116   : > { %v602_v23 = vpop.permute.xlu1 %601  ;;  %v600_v21 = vpop.permute.xlu0 %599  ;;  %v963_v19 = vsel %vm945_vm12, %v961_v16, %v962_v14 }
 0x117   : > { %662 = vst.msk [vmem:[#allocation3 + $0x68] sm:$0xff] %vm647_vm6, %v602_v23  ;;  %661 = vst.msk [vmem:[#allocation3 + $0x60] sm:$0xff] %vm647_vm6, %v600_v21  ;;  %v1070_v23 = vrot.slane %v785_v58, 3  ;;  %v1067_v21 = vrot.slane %v2585_v60, 3 }
 0x118   : > { %890 = vrot.lane.b32.xlu1 %v854_v22, %s1966_s10  ;;  %888 = vrot.lane.b32.xlu0 %v852_v24, %s1966_s10 }
 0x119   : > { %v1071_v25 = vsel %vm1051_vm13, %v1068_v20, %v1070_v23  ;;  %v1069_v28 = vsel %vm1051_vm13, %v1067_v21, %v1068_v20 }
 0x11a   : > { %v701_v47 = vpop.permute.xlu1 %700  ;;  %v604_v9 = vpop.permute.xlu0 %603 }
 0x11b   : > { %762 = vst.msk [vmem:[#allocation3 + $0x60] sm:$0xff] %vm748_vm7, %v701_v47  ;;  %v1176_v47 = vrot.slane %v785_v58, 4 }
 0x11c   : > { %663 = vst.msk [vmem:[#allocation3 + $0x70] sm:$0xf] %vm650_vm8, %v604_v9  ;;  %996 = vrot.lane.b32.xlu1 %v960_v48, %s1967_s11  ;;  %994 = vrot.lane.b32.xlu0 %v958_v49, %s1967_s11  ;;  %v1173_v48 = vrot.slane %v2585_v60, 4 }
 0x11d   : > { %v1177_v51 = vsel %vm1157_vm14, %v1174_v46, %v1176_v47  ;;  %v1970_v47 = vmov 0.0|0.0  }
 0x11e   : > { %v705_v52 = vpop.permute.xlu1 %704  ;;  %v703_v53 = vpop.permute.xlu0 %702  ;;  %v1175_v50 = vsel %vm1157_vm14, %v1173_v48, %v1174_v46  ;;  %1743 = vmatprep.subr.bf16.mxu0 %v1970_v47 }
 0x11f   : > { %764 = vst.msk [vmem:[#allocation3 + $0x70] sm:$0xf] %vm751_vm9, %v705_v52 }
 0x120   : > { %763 = vst.msk [vmem:[#allocation3 + $0x68] sm:$0xff] %vm748_vm7, %v703_v53  ;;  %1102 = vrot.lane.b32.xlu1 %v1066_v54, %s1968_s20  ;;  %1100 = vrot.lane.b32.xlu0 %v1064_v55, %s1968_s20 }
 0x122   : > { %v406_v62 = vpop.permute.xlu1 %405  ;;  %v404_v63 = vpop.permute.xlu0 %403  ;;  %v2641_v1 = vld [vmem:[#allocation3 + $0x60] sm:$0xff] }
 0x123   : > { %463 = vst.msk [vmem:[#allocation3 + $0x80] sm:$0xff] %vm445_vm3, %v406_v62  ;;  %462 = vst.msk [vmem:[#allocation3 + $0x78] sm:$0xff] %vm445_vm3, %v404_v63  ;;  %v860_v53 = vrot.slane %v2641_v1, 1  ;;  %v966_v61 = vrot.slane %v2641_v1, 2 }
 0x124   : > { %807 = vst.msk [vmem:[#allocation4 + $0x40] sm:$0xff] %vm798_vm10, %v2641_v1  ;;  %1208 = vrot.lane.b32.xlu1 %v1172_v3, %s1969_s21  ;;  %1206 = vrot.lane.b32.xlu0 %v1170_v2, %s1969_s21 }
 0x126   : > { %v505_v8 = vpop.permute.xlu1 %504  ;;  %v408_v10 = vpop.permute.xlu0 %407  ;;  %v788_v9 = vld [vmem:[#allocation3 + $0x70] sm:$0xf] }
 0x127   : > { %v2653_v11 = vld [vmem:[#allocation3 + $0x68] sm:$0xff]  ;;  %563 = vst.msk [vmem:[#allocation3 + $0x78] sm:$0xff] %vm546_vm4, %v505_v8  ;;  %v863_v52 = vrot.slane %v788_v9, 1  ;;  %v969_v58 = vrot.slane %v788_v9, 2  ;;  %v1075_v59 = vrot.slane %v788_v9, 3  ;;  %v1072_v8 = vrot.slane %v2641_v1, 3 }
 0x128   : > { %464 = vst.msk [vmem:[#allocation3 + $0x88] sm:$0xf] %vm448_vm2, %v408_v10  ;;  %894 = vrot.lane.b32.xlu1 %v859_v12, %s1966_s10  ;;  %892 = vrot.lane.b32.xlu0 %v857_v13, %s1966_s10  ;;  %v861_v7 = vrot.slane %v2653_v11, 1  ;;  %v967_v57 = vrot.slane %v2653_v11, 2  ;;  %v1073_v5 = vrot.slane %v2653_v11, 3  ;;  %v1288_v10 = vrot.slane %v2204_v27, 2 }
 0x129   : > { %808 = vst.msk [vmem:[#allocation4 + $0x48] sm:$0xff] %vm798_vm10, %v2653_v11  ;;  %v1179_v14 = vrot.slane %v2653_v11, 4  ;;  %v1181_v15 = vrot.slane %v788_v9, 4  ;;  %v1178_v27 = vrot.slane %v2641_v1, 4 }
 0x12a   : > { %v509_v17 = vpop.permute.xlu1 %508  ;;  %v507_v26 = vpop.permute.xlu0 %506  ;;  %v864_v55 = vsel %vm839_vm11, %v861_v7, %v863_v52  ;;  %v862_v56 = vsel %vm839_vm11, %v860_v53, %v861_v7  ;;  %v970_v2 = vsel %vm945_vm12, %v967_v57, %v969_v58  ;;  %v968_v4 = vsel %vm945_vm12, %v966_v61, %v967_v57 }
 0x12b   : > { %565 = vst.msk [vmem:[#allocation3 + $0x88] sm:$0xf] %vm549_vm5, %v509_v17  ;;  %v1291_v17 = vrot.slane %v2213_v29, 2  ;;  %v1182_v20 = vsel %vm1157_vm14, %v1179_v14, %v1181_v15  ;;  %v1180_v23 = vsel %vm1157_vm14, %v1178_v27, %v1179_v14  ;;  %v1294_v7 = vrot.slane %v2222_v31, 2 }
 0x12c   : > { %564 = vst.msk [vmem:[#allocation3 + $0x80] sm:$0xff] %vm546_vm4, %v507_v26  ;;  %1000 = vrot.lane.b32.xlu1 %v965_v18, %s1967_s11  ;;  %998 = vrot.lane.b32.xlu0 %v963_v19, %s1967_s11  ;;  %v1289_v26 = vrot.slane %v2215_v30, 2  ;;  %v1076_v18 = vsel %vm1051_vm13, %v1073_v5, %v1075_v59  ;;  %v1074_v19 = vsel %vm1051_vm13, %v1072_v8, %v1073_v5  ;;  %v1293_v52 = vrot.slane %v2224_v32, 2 }
 0x12d   : > { %v1296_v53 = vrot.slane %v2234_v34, 2  ;;  %v1298_v15 = vrot.slane %v2226_v33, 2 }
 0x12e   : > { %v608_v22 = vpop.permute.xlu1 %607  ;;  %v606_v24 = vpop.permute.xlu0 %605  ;;  %v1292_v1 = vsel %vm945_vm12, %v1289_v26, %v1291_v17  ;;  %v1295_v57 = vsel %vm945_vm12, %v1293_v52, %v1294_v7  ;;  %v1301_v17 = vrot.slane %v2236_v35, 2 }
 0x12f   : > { %665 = vst.msk [vmem:[#allocation3 + $0x80] sm:$0xff] %vm647_vm6, %v608_v22  ;;  %664 = vst.msk [vmem:[#allocation3 + $0x78] sm:$0xff] %vm647_vm6, %v606_v24  ;;  %v1290_v24 = vsel %vm945_vm12, %v1288_v10, %v1289_v26  ;;  %v1297_v58 = vsel %vm945_vm12, %v1294_v7, %v1296_v53 }
 0x130   : > { %1106 = vrot.lane.b32.xlu1 %v1071_v25, %s1968_s20  ;;  %1104 = vrot.lane.b32.xlu0 %v1069_v28, %s1968_s20  ;;  %v1744_v28 = vpack.c.bf16 %v1292_v1, %v1290_v24  ;;  %v1972_v25 = vmov 0  }
 0x131   : > { %1858 = vset.pattern.permute.xlu0 %v1972_v25 }
 0x132   : > { %v707_v49 = vpop.permute.xlu1 %706  ;;  %v610_v6 = vpop.permute.xlu0 %609  ;;  %1746 = vmatpush3.bf16.xpose.msk.msra.mxu0 %vm2736_vm15, %v1744_v28 }
 0x133   : > { %765 = vst.msk [vmem:[#allocation3 + $0x78] sm:$0xff] %vm748_vm7, %v707_v49  ;;  %1747 = vmatprep.subr.bf16.mxu0 %v1970_v47 }
 0x134   : > { %666 = vst.msk [vmem:[#allocation3 + $0x88] sm:$0xf] %vm650_vm8, %v610_v6  ;;  %1212 = vrot.lane.b32.xlu1 %v1177_v51, %s1969_s21  ;;  %1210 = vrot.lane.b32.xlu0 %v1175_v50, %s1969_s21 }
 0x136   : > { %v711_v60 = vpop.permute.xlu1 %710  ;;  %v709_v54 = vpop.permute.xlu0 %708 }
 0x137   : > { %767 = vst.msk [vmem:[#allocation3 + $0x88] sm:$0xf] %vm751_vm9, %v711_v60 }
 0x138   : > { %766 = vst.msk [vmem:[#allocation3 + $0x80] sm:$0xff] %vm748_vm7, %v709_v54  ;;  %898 = vrot.lane.b32.xlu1 %v864_v55, %s1966_s10  ;;  %896 = vrot.lane.b32.xlu0 %v862_v56, %s1966_s10 }
 0x13a   : > { %v412_v62 = vpop.permute.xlu1 %411  ;;  %v410_v63 = vpop.permute.xlu0 %409  ;;  %v2697_v3 = vld [vmem:[#allocation3 + $0x78] sm:$0xff] }
 0x13b   : > { %466 = vst.msk [vmem:[#allocation3 + $0x98] sm:$0xff] %vm445_vm3, %v412_v62  ;;  %465 = vst.msk [vmem:[#allocation3 + $0x90] sm:$0xff] %vm445_vm3, %v410_v63  ;;  %v865_v46 = vrot.slane %v2697_v3, 1  ;;  %v971_v60 = vrot.slane %v2697_v3, 2  ;;  %v1077_v61 = vrot.slane %v2697_v3, 3  ;;  %v1748_v62 = vpack.c.bf16 %v1297_v58, %v1295_v57 }
 0x13c   : > { %809 = vst.msk [vmem:[#allocation4 + $0x50] sm:$0xff] %vm798_vm10, %v2697_v3  ;;  %1004 = vrot.lane.b32.xlu1 %v970_v2, %s1967_s11  ;;  %1002 = vrot.lane.b32.xlu0 %v968_v4, %s1967_s11  ;;  %v1183_v10 = vrot.slane %v2697_v3, 4  ;;  %v1308_v57 = vrot.slane %v2259_v40, 2  ;;  %v1309_v58 = vrot.slane %v2269_v42, 2 }
 0x13d   : > { %1750 = vmatpush3.bf16.xpose.msk.msra.mxu0 %vm2736_vm15, %v1748_v62 }
 0x13e   : > { %v511_v12 = vpop.permute.xlu1 %510  ;;  %v414_v13 = vpop.permute.xlu0 %413  ;;  %v2724_v29 = vld [vmem:[#allocation3 + $0x88] sm:$0xf]  ;;  %1751 = vmatprep.subr.bf16.mxu0 %v1970_v47 }
 0x13f   : > { %v2711_v16 = vld [vmem:[#allocation3 + $0x80] sm:$0xff]  ;;  %566 = vst.msk [vmem:[#allocation3 + $0x90] sm:$0xff] %vm546_vm4, %v511_v12  ;;  %v868_v22 = vrot.slane %v2724_v29, 1  ;;  %v974_v50 = vrot.slane %v2724_v29, 2  ;;  %v1080_v34 = vrot.slane %v2724_v29, 3  ;;  %v1186_v8 = vrot.slane %v2724_v29, 4 }
 0x140   : > { %467 = vst.msk [vmem:[#allocation3 + $0xa0] sm:$0xf] %vm448_vm2, %v414_v13  ;;  %1110 = vrot.lane.b32.xlu1 %v1076_v18, %s1968_s20  ;;  %1108 = vrot.lane.b32.xlu0 %v1074_v19, %s1968_s20  ;;  %v866_v21 = vrot.slane %v2711_v16, 1  ;;  %v972_v51 = vrot.slane %v2711_v16, 2  ;;  %v1078_v32 = vrot.slane %v2711_v16, 3  ;;  %v1184_v59 = vrot.slane %v2711_v16, 4 }
 0x141   : > { %810 = vst.msk [vmem:[#allocation4 + $0x58] sm:$0xff] %vm798_vm10, %v2711_v16  ;;  %v1299_v16 = vrot.slane %v2242_v36, 2 }
 0x142   : > { %v515_v30 = vpop.permute.xlu1 %514  ;;  %v513_v11 = vpop.permute.xlu0 %512  ;;  %v869_v49 = vsel %vm839_vm11, %v866_v21, %v868_v22  ;;  %v867_v6 = vsel %vm839_vm11, %v865_v46, %v866_v21  ;;  %v975_v56 = vsel %vm945_vm12, %v972_v51, %v974_v50  ;;  %v973_v31 = vsel %vm945_vm12, %v971_v60, %v972_v51 }
 0x143   : > { %568 = vst.msk [vmem:[#allocation3 + $0xa0] sm:$0xf] %vm549_vm5, %v515_v30  ;;  %v1081_v4 = vsel %vm1051_vm13, %v1078_v32, %v1080_v34  ;;  %v1079_v5 = vsel %vm1051_vm13, %v1077_v61, %v1078_v32  ;;  %v1187_v26 = vsel %vm1157_vm14, %v1184_v59, %v1186_v8  ;;  %v1185_v3 = vsel %vm1157_vm14, %v1183_v10, %v1184_v59 }
 0x144   : > { %567 = vst.msk [vmem:[#allocation3 + $0x98] sm:$0xff] %vm546_vm4, %v513_v11  ;;  %1216 = vrot.lane.b32.xlu1 %v1182_v20, %s1969_s21  ;;  %1214 = vrot.lane.b32.xlu0 %v1180_v23, %s1969_s21  ;;  %v1300_v33 = vsel %vm945_vm12, %v1298_v15, %v1299_v16  ;;  %v1302_v36 = vsel %vm945_vm12, %v1299_v16, %v1301_v17  ;;  %v1303_v46 = vrot.slane %v2244_v37, 2  ;;  %v1311_v61 = vrot.slane %v2261_v41, 2 }
 0x145   : > { %v1752_v35 = vpack.c.bf16 %v1302_v36, %v1300_v33 }
 0x146   : > { %v614_v9 = vpop.permute.xlu1 %613  ;;  %v612_v48 = vpop.permute.xlu0 %611 }
 0x147   : > { %668 = vst.msk [vmem:[#allocation3 + $0x98] sm:$0xff] %vm647_vm6, %v614_v9  ;;  %667 = vst.msk [vmem:[#allocation3 + $0x90] sm:$0xff] %vm647_vm6, %v612_v48  ;;  %1754 = vmatpush3.bf16.xpose.msk.msra.mxu0 %vm2736_vm15, %v1752_v35  ;;  %v1304_v48 = vrot.slane %v2257_v39, 2 }
 0x148   : > { %902 = vrot.lane.b32.xlu1 %v869_v49, %s1966_s10  ;;  %900 = vrot.lane.b32.xlu0 %v867_v6, %s1966_s10  ;;  %v1306_v49 = vrot.slane %v2246_v38, 2 }
 0x149   : > { %1755 = vmatprep.subr.bf16.mxu0 %v1970_v47  ;;  %v1305_v52 = vsel %vm945_vm12, %v1303_v46, %v1304_v48 }
 0x14a   : > { %v713_v54 = vpop.permute.xlu1 %712  ;;  %v616_v55 = vpop.permute.xlu0 %615  ;;  %v1307_v37 = vsel %vm945_vm12, %v1304_v48, %v1306_v49 }
 0x14b   : > { %768 = vst.msk [vmem:[#allocation3 + $0x90] sm:$0xff] %vm748_vm7, %v713_v54  ;;  %v1756_v54 = vpack.c.bf16 %v1307_v37, %v1305_v52  ;;  %v1862_v37 = vld [vmem:[#allocation2 + $0xd8] sm:$0xff] }
 0x14c   : > { %669 = vst.msk [vmem:[#allocation3 + $0xa0] sm:$0xf] %vm650_vm8, %v616_v55  ;;  %1008 = vrot.lane.b32.xlu1 %v975_v56, %s1967_s11  ;;  %1006 = vrot.lane.b32.xlu0 %v973_v31, %s1967_s11 }
 0x14e   : > { %v717_v63 = vpop.permute.xlu1 %716  ;;  %v715_v2 = vpop.permute.xlu0 %714 }
 0x14f   : > { %770 = vst.msk [vmem:[#allocation3 + $0xa0] sm:$0xf] %vm751_vm9, %v717_v63  ;;  %1758 = vmatpush3.bf16.xpose.msk.msra.mxu0 %vm2736_vm15, %v1756_v54  ;;  %v1310_v63 = vsel %vm945_vm12, %v1308_v57, %v1309_v58 }
 0x150   : > { %769 = vst.msk [vmem:[#allocation3 + $0x98] sm:$0xff] %vm748_vm7, %v715_v2  ;;  %1114 = vrot.lane.b32.xlu1 %v1081_v4, %s1968_s20  ;;  %1112 = vrot.lane.b32.xlu0 %v1079_v5, %s1968_s20  ;;  %v1312_v2 = vsel %vm945_vm12, %v1309_v58, %v1311_v61 }
 0x151   : > { %1759 = vmatprep.subr.bf16.mxu0 %v1970_v47  ;;  %v1760_v59 = vpack.c.bf16 %v1312_v2, %v1310_v63 }
 0x152   : > { %v418_v12 = vpop.permute.xlu1 %417  ;;  %v416_v13 = vpop.permute.xlu0 %415  ;;  %v2782_v14 = vld [vmem:[#allocation3 + $0x90] sm:$0xff] }
 0x153   : > { %469 = vst.msk [vmem:[#allocation3 + $0xb0] sm:$0xff] %vm445_vm3, %v418_v12  ;;  %468 = vst.msk [vmem:[#allocation3 + $0xa8] sm:$0xff] %vm445_vm3, %v416_v13  ;;  %v870_v20 = vrot.slane %v2782_v14, 1  ;;  %v976_v9 = vrot.slane %v2782_v14, 2  ;;  %v1082_v38 = vrot.slane %v2782_v14, 3  ;;  %v1188_v62 = vrot.slane %v2782_v14, 4 }
 0x154   : > { %811 = vst.msk [vmem:[#allocation4 + $0x60] sm:$0xff] %vm798_vm10, %v2782_v14  ;;  %1220 = vrot.lane.b32.xlu1 %v1187_v26, %s1969_s21  ;;  %1218 = vrot.lane.b32.xlu0 %v1185_v3, %s1969_s21  ;;  %v1313_v12 = vrot.slane %v2271_v43, 2  ;;  %v1314_v13 = vrot.slane %v2281_v45, 2  ;;  %v1316_v14 = vrot.slane %v2273_v44, 2  ;;  %v1859_v26 = vld [vmem:[#allocation2 + $0xc0] sm:$0xff]  ;;  %vm1140_vm3 = vcmask 654816  }
 0x155   : > { %v1318_v3 = vrot.slane %v1859_v26, 2  ;;  %v1860_v43 = vld [vmem:[#allocation2 + $0xd0] sm:$0xf] }
 0x156   : > { %v517_v18 = vpop.permute.xlu1 %516  ;;  %v420_v19 = vpop.permute.xlu0 %419  ;;  %v794_v29 = vld [vmem:[#allocation3 + $0xa0] sm:$0xf]  ;;  %v1315_v15 = vsel %vm945_vm12, %v1313_v12, %v1314_v13  ;;  %v1317_v16 = vsel %vm945_vm12, %v1314_v13, %v1316_v14  ;;  %v1321_v33 = vrot.slane %v1860_v43, 2 }
 0x157   : > { %v793_v27 = vld [vmem:[#allocation3 + $0x98] sm:$0xff]  ;;  %569 = vst.msk [vmem:[#allocation3 + $0xa8] sm:$0xff] %vm546_vm4, %v517_v18  ;;  %v873_v11 = vrot.slane %v794_v29, 1  ;;  %v979_v24 = vrot.slane %v794_v29, 2  ;;  %v1085_v51 = vrot.slane %v794_v29, 3  ;;  %v1191_v31 = vrot.slane %v794_v29, 4  ;;  %1762 = vmatpush3.bf16.xpose.msk.msra.mxu0 %vm2736_vm15, %v1760_v59 }
 0x158   : > { %470 = vst.msk [vmem:[#allocation3 + $0xb8] sm:$0xf] %vm448_vm2, %v420_v19  ;;  %v871_v30 = vrot.slane %v793_v27, 1  ;;  %v977_v22 = vrot.slane %v793_v27, 2  ;;  %v1083_v6 = vrot.slane %v793_v27, 3  ;;  %v1189_v56 = vrot.slane %v793_v27, 4  ;;  %1763 = vmatprep.subr.bf16.mxu0 %v1970_v47 }
 0x159   : > { %812 = vst.msk [vmem:[#allocation4 + $0x68] sm:$0xff] %vm798_vm10, %v793_v27  ;;  %vm1034_vm2 = vcmask 490816   ;;  %v1764_v17 = vpack.c.bf16 %v1317_v16, %v1315_v15  ;;  %v1861_v18 = vld [vmem:[#allocation2 + $0xc8] sm:$0xff]  ;;  %v1440_v15 = vld [vmem:[%s3052_s2] sm:$0xf] }
 0x15a   : > { %v874_v23 = vsel %vm839_vm11, %v871_v30, %v873_v11  ;;  %v872_v21 = vsel %vm839_vm11, %v870_v20, %v871_v30  ;;  %v521_v1 = vpop.permute.xlu1 %520  ;;  %v519_v28 = vpop.permute.xlu0 %518  ;;  %v980_v50 = vsel %vm945_vm12, %v977_v22, %v979_v24  ;;  %v978_v7 = vsel %vm945_vm12, %v976_v9, %v977_v22 }
 0x15b   : > { %906 = vrot.lane.b32.xlu1 %v874_v23, %s1966_s10  ;;  %904 = vrot.lane.b32.xlu0 %v872_v21, %s1966_s10  ;;  %571 = vst.msk [vmem:[#allocation3 + $0xb8] sm:$0xf] %vm549_vm5, %v521_v1  ;;  %v1086_v39 = vsel %vm1051_vm13, %v1083_v6, %v1085_v51  ;;  %v1084_v55 = vsel %vm1051_vm13, %v1082_v38, %v1083_v6  ;;  %v1319_v19 = vrot.slane %v1861_v18, 2  ;;  %v1864_v38 = vld [vmem:[#allocation2 + $0xe0] sm:$0xff]  ;;  %vm1971_vm5 = vmmov 0  }
 0x15c   : > { %570 = vst.msk [vmem:[#allocation3 + $0xb0] sm:$0xff] %vm546_vm4, %v519_v28  ;;  %v1192_v4 = vsel %vm1157_vm14, %v1189_v56, %v1191_v31  ;;  %v1190_v5 = vsel %vm1157_vm14, %v1188_v62, %v1189_v56  ;;  %vm1246_vm4 = vcmask 818816   ;;  %1739 = vmatprep.mubr.msk.bf16.mxu1 %vm1971_vm5, %v1961_v0  ;;  %1720 = vmatprep.mubr.msk.f32.mxu0 %vm1971_vm5, %v1961_v0 }
 0x15d   : > { %v1320_v28 = vsel %vm945_vm12, %v1318_v3, %v1319_v19  ;;  %v1322_v46 = vsel %vm945_vm12, %v1319_v19, %v1321_v33 }
 0x15e   : > { %v620_v53 = vpop.permute.xlu1 %619  ;;  %v618_v60 = vpop.permute.xlu0 %617  ;;  %v1768_v9 = vpack.c.bf16 %v1322_v46, %v1320_v28 }
 0x15f   : > { %1012 = vrot.lane.b32.xlu1 %v980_v50, %s1967_s11  ;;  %1010 = vrot.lane.b32.xlu0 %v978_v7, %s1967_s11  ;;  %671 = vst.msk [vmem:[#allocation3 + $0xb0] sm:$0xff] %vm647_vm6, %v620_v53  ;;  %670 = vst.msk [vmem:[#allocation3 + $0xa8] sm:$0xff] %vm647_vm6, %v618_v60  ;;  %v1323_v53 = vrot.slane %v1862_v37, 2  ;;  %v1863_v60 = vld [vmem:[#allocation2 + $0xe8] sm:$0xf]  ;;  %vm1446_vm6 = vcmask 818176  }
 0x160   : > { %1766 = vmatpush3.bf16.xpose.msk.msra.mxu0 %vm2736_vm15, %v1764_v17  ;;  %v1326_v54 = vrot.slane %v1863_v60, 2 }
 0x161   : > { %1767 = vmatprep.subr.bf16.mxu0 %v1970_v47 }
 0x162   : > { %v719_v32 = vpop.permute.xlu1 %718  ;;  %v622_v34 = vpop.permute.xlu0 %621 }
 0x163   : > { %1118 = vrot.lane.b32.xlu1 %v1086_v39, %s1968_s20  ;;  %1116 = vrot.lane.b32.xlu0 %v1084_v55, %s1968_s20  ;;  %771 = vst.msk [vmem:[#allocation3 + $0xa8] sm:$0xff] %vm748_vm7, %v719_v32  ;;  %v1324_v39 = vrot.slane %v1864_v38, 2 }
 0x164   : > { %672 = vst.msk [vmem:[#allocation3 + $0xb8] sm:$0xf] %vm650_vm8, %v622_v34 }
 0x165   : > { %v1325_v61 = vsel %vm945_vm12, %v1323_v53, %v1324_v39  ;;  %v1327_v62 = vsel %vm945_vm12, %v1324_v39, %v1326_v54 }
 0x166   : > { %v723_v40 = vpop.permute.xlu1 %722  ;;  %v721_v8 = vpop.permute.xlu0 %720  ;;  %v1772_v2 = vpack.c.bf16 %v1327_v62, %v1325_v61 }
 0x167   : > { %1224 = vrot.lane.b32.xlu1 %v1192_v4, %s1969_s21  ;;  %1222 = vrot.lane.b32.xlu0 %v1190_v5, %s1969_s21  ;;  %773 = vst.msk [vmem:[#allocation3 + $0xb8] sm:$0xf] %vm751_vm9, %v723_v40 }
 0x168   : > { %772 = vst.msk [vmem:[#allocation3 + $0xb0] sm:$0xff] %vm748_vm7, %v721_v8  ;;  %1770 = vmatpush3.bf16.xpose.msk.msra.mxu0 %vm2736_vm15, %v1768_v9 }
 0x169   : > { %1771 = vmatprep.subr.bf16.mxu0 %v1970_v47 }
 0x16a   : > { %v883_v41 = vpop.permute.xlu1 %882  ;;  %v881_v42 = vpop.permute.xlu0 %880  ;;  %v2847_v10 = vld [vmem:[#allocation3 + $0xa8] sm:$0xff] }
 0x16b   : > { %930 = vst.msk [vmem:[#allocation4 + $0x8] sm:$0xff] %vm928_vm1, %v883_v41  ;;  %929 = vst.msk [vmem:[#allocation4] sm:$0xff] %vm928_vm1, %v881_v42  ;;  %v875_v30 = vrot.slane %v2847_v10, 1  ;;  %v981_v1 = vrot.slane %v2847_v10, 2  ;;  %v1087_v52 = vrot.slane %v2847_v10, 3  ;;  %v1193_v58 = vrot.slane %v2847_v10, 4 }
 0x16c   : > { %813 = vst.msk [vmem:[#allocation4 + $0x70] sm:$0xff] %vm798_vm10, %v2847_v10  ;;  %v1328_v41 = vlaneseq }
 0x16e   : > { %v989_v45 = vpop.permute.xlu1 %988  ;;  %v987_v36 = vpop.permute.xlu0 %986  ;;  %v797_v35 = vld [vmem:[#allocation3 + $0xb8] sm:$0xf]  ;;  %v1329_v13 = vshrl.u32 %v1328_v41, 7  ;;  %v1331_v14 = vand.u32 127, %v1328_v41 }
 0x16f   : > { %v2858_v44 = vld [vmem:[#allocation3 + $0xb0] sm:$0xff]  ;;  %1036 = vst.msk [vmem:[#allocation4 + $0x8] sm:$0xff] %vm1034_vm2, %v989_v45  ;;  %1035 = vst.msk [vmem:[#allocation4] sm:$0xff] %vm1034_vm2, %v987_v36  ;;  %v878_v29 = vrot.slane %v797_v35, 1  ;;  %v984_v21 = vrot.slane %v797_v35, 2  ;;  %v1090_v51 = vrot.slane %v797_v35, 3 }
 0x170   : > { %v876_v27 = vrot.slane %v2858_v44, 1  ;;  %814 = vst.msk [vmem:[#allocation4 + $0x78] sm:$0xff] %vm798_vm10, %v2858_v44  ;;  %v982_v23 = vrot.slane %v2858_v44, 2  ;;  %v1088_v6 = vrot.slane %v2858_v44, 3  ;;  %v1194_v31 = vrot.slane %v2858_v44, 4  ;;  %1774 = vmatpush3.bf16.xpose.msk.msra.mxu0 %vm2736_vm15, %v1772_v2 }
 0x171   : > { %v1196_v32 = vrot.slane %v797_v35, 4  ;;  %vm1332_vm7 = vcmp.eq.s32.totalorder %v1329_v13, %v1331_v14 }
 0x172   : > { %v879_v11 = vsel %vm839_vm11, %v876_v27, %v878_v29  ;;  %v877_v20 = vsel %vm839_vm11, %v875_v30, %v876_v27  ;;  %v1095_v22 = vpop.permute.xlu1 %1094  ;;  %v1093_v24 = vpop.permute.xlu0 %1092  ;;  %v985_v48 = vsel %vm945_vm12, %v982_v23, %v984_v21  ;;  %v983_v49 = vsel %vm945_vm12, %v981_v1, %v982_v23 }
 0x173   : > { %910 = vrot.lane.b32.xlu1 %v879_v11, %s1966_s10  ;;  %908 = vrot.lane.b32.xlu0 %v877_v20, %s1966_s10  ;;  %1142 = vst.msk [vmem:[#allocation4 + $0x8] sm:$0xff] %vm1140_vm3, %v1095_v22  ;;  %1141 = vst.msk [vmem:[#allocation4] sm:$0xff] %vm1140_vm3, %v1093_v24  ;;  %v1091_v55 = vsel %vm1051_vm13, %v1088_v6, %v1090_v51  ;;  %v1089_v56 = vsel %vm1051_vm13, %v1087_v52, %v1088_v6  ;;  %v1635_v16 = vsel %vm1332_vm7, 1.0, %v1961_v0  ;;  %s1535_s10 = sshll.u32 %s177_s24, 4  ;;  %s2995_s10 = int_to_ptr.vmem [resolvable:$true] %s1535_s10 }
 0x174   : > { %v1197_v63 = vsel %vm1157_vm14, %v1194_v31, %v1196_v32  ;;  %v1195_v47 = vsel %vm1157_vm14, %v1193_v58, %v1194_v31  ;;  %p1872_p5 = scmp.lt.s32.totalorder %s2995_s10, %s1870_s28 }
 0x176   : > { %v1201_v50 = vpop.permute.xlu1 %1200  ;;  %v1199_v7 = vpop.permute.xlu0 %1198 }
 0x177   : > { %1016 = vrot.lane.b32.xlu1 %v985_v48, %s1967_s11  ;;  %1014 = vrot.lane.b32.xlu0 %v983_v49, %s1967_s11  ;;  %1248 = vst.msk [vmem:[#allocation4 + $0x8] sm:$0xff] %vm1246_vm4, %v1201_v50  ;;  %1247 = vst.msk [vmem:[#allocation4] sm:$0xff] %vm1246_vm4, %v1199_v7 }
 0x178   : > { %1721 = vmatmul.mubr.msk.f32.vlgmr.msra.gmra.mrb[0].mxu0 %vm185_vm0, %v1635_v16 }
 0x17a   : > { %v887_v34 = vpop.permute.xlu1 %886  ;;  %v885_v57 = vpop.permute.xlu0 %884 }
 0x17b   : > { %1122 = vrot.lane.b32.xlu1 %v1091_v55, %s1968_s20  ;;  %1120 = vrot.lane.b32.xlu0 %v1089_v56, %s1968_s20  ;;  %932 = vst.msk [vmem:[#allocation4 + $0x18] sm:$0xff] %vm928_vm1, %v887_v34  ;;  %931 = vst.msk [vmem:[#allocation4 + $0x10] sm:$0xff] %vm928_vm1, %v885_v57 }
 0x17e   : > { %v993_v4 = vpop.permute.xlu1 %992  ;;  %v991_v5 = vpop.permute.xlu0 %990  ;;  %v1263_v59 = vld [vmem:[#allocation4] sm:$0xff]  ;;  %v1264_v40 = vld [vmem:[#allocation4 + $0x8] sm:$0xff] }
 0x17f   : > { %1228 = vrot.lane.b32.xlu1 %v1197_v63, %s1969_s21  ;;  %1226 = vrot.lane.b32.xlu0 %v1195_v47, %s1969_s21  ;;  %1038 = vst.msk [vmem:[#allocation4 + $0x18] sm:$0xff] %vm1034_vm2, %v993_v4  ;;  %1037 = vst.msk [vmem:[#allocation4 + $0x10] sm:$0xff] %vm1034_vm2, %v991_v5  ;;  %v1279_v8 = vpack.c.bf16 %v1264_v40, %v1263_v59  ;;  %s1865_s21 = scalar_lea.vmem %s2995_s10, 64 }
 0x180   : > { %p1866_p1 = scmp.ne.s32.totalorder %s2995_s10, %s1865_s21  ;;  %p1873_p6 = scmp.lt.s32.totalorder %s1871_s29, %s1865_s21 }
 0x181   : > { %v1451_v42 = vsel %vm1446_vm6, %v1279_v8, 0 }
 0x182   : > { %v1099_v10 = vpop.permute.xlu1 %1098  ;;  %v1097_v12 = vpop.permute.xlu0 %1096  ;;  %1724 = vmatpush3.bf16.xpose.msra.mxu1 %v1451_v42  ;;  %p1867_p2 = pnand %p1866_p1, %p2045_p3  ;;  %p1874_p7 = por %p1873_p6, %p1872_p5 }
 0x183   : > { %1144 = vst.msk [vmem:[#allocation4 + $0x18] sm:$0xff] %vm1140_vm3, %v1099_v10  ;;  %1143 = vst.msk [vmem:[#allocation4 + $0x10] sm:$0xff] %vm1140_vm3, %v1097_v12  ;;  %1725 = vmatprep.subr.bf16.mxu1 %v1961_v0  ;;  %1443 = vperm.xlu0 %1858, %v1440_v15  }
 0x184   : > { %p1868_p4 = pneg %p1867_p2 }
 0x186   : > { %v1205_v17 = vpop.permute.xlu1 %1204  ;;  %v1203_v26 = vpop.permute.xlu0 %1202  ;;  %p1875_p9 = pnand %p1874_p7, %p1868_p4 }
 0x187   : > { %1250 = vst.msk [vmem:[#allocation4 + $0x18] sm:$0xff] %vm1246_vm4, %v1205_v17  ;;  %1249 = vst.msk [vmem:[#allocation4 + $0x10] sm:$0xff] %vm1246_vm4, %v1203_v26 }
 0x18a   : > { %v891_v3 = vpop.permute.xlu1 %890  ;;  %v889_v43 = vpop.permute.xlu0 %888 }
 0x18b   : > { %934 = vst.msk [vmem:[#allocation4 + $0x28] sm:$0xff] %vm928_vm1, %v891_v3  ;;  %933 = vst.msk [vmem:[#allocation4 + $0x20] sm:$0xff] %vm928_vm1, %v889_v43 }
 0x18e   : > { %v997_v33 = vpop.permute.xlu1 %996  ;;  %v995_v45 = vpop.permute.xlu0 %994  ;;  %v1265_v36 = vld [vmem:[#allocation4 + $0x10] sm:$0xff]  ;;  %v1266_v44 = vld [vmem:[#allocation4 + $0x18] sm:$0xff] }
 0x18f   : > { %1040 = vst.msk [vmem:[#allocation4 + $0x28] sm:$0xff] %vm1034_vm2, %v997_v33  ;;  %1039 = vst.msk [vmem:[#allocation4 + $0x20] sm:$0xff] %vm1034_vm2, %v995_v45  ;;  %v1280_v35 = vpack.c.bf16 %v1266_v44, %v1265_v36 }
 0x191   : > { %v1454_v18 = vsel %vm1446_vm6, %v1280_v35, 0 }
 0x192   : > { %v1103_v19 = vpop.permute.xlu1 %1102  ;;  %v1101_v27 = vpop.permute.xlu0 %1100  ;;  %1726 = vmatpush3.bf16.xpose.msra.mxu1 %v1454_v18 }
 0x193   : > { %1146 = vst.msk [vmem:[#allocation4 + $0x28] sm:$0xff] %vm1140_vm3, %v1103_v19  ;;  %1145 = vst.msk [vmem:[#allocation4 + $0x20] sm:$0xff] %vm1140_vm3, %v1101_v27  ;;  %1727 = vmatprep.subr.bf16.mxu1 %v1961_v0 }
 0x196   : > { %v1209_v29 = vpop.permute.xlu1 %1208  ;;  %v1207_v30 = vpop.permute.xlu0 %1206 }
 0x197   : > { %1252 = vst.msk [vmem:[#allocation4 + $0x28] sm:$0xff] %vm1246_vm4, %v1209_v29  ;;  %1251 = vst.msk [vmem:[#allocation4 + $0x20] sm:$0xff] %vm1246_vm4, %v1207_v30 }
 0x19a   : > { %v895_v11 = vpop.permute.xlu1 %894  ;;  %v893_v20 = vpop.permute.xlu0 %892 }
 0x19b   : > { %936 = vst.msk [vmem:[#allocation4 + $0x38] sm:$0xff] %vm928_vm1, %v895_v11  ;;  %935 = vst.msk [vmem:[#allocation4 + $0x30] sm:$0xff] %vm928_vm1, %v893_v20  ;;  %v1287_v11 = vld [vmem:[%s3051_s1] sm:$0x3] }
 0x19e   : > { %v1001_v23 = vpop.permute.xlu1 %1000  ;;  %v999_v21 = vpop.permute.xlu0 %998  ;;  %v1267_v22 = vld [vmem:[#allocation4 + $0x20] sm:$0xff]  ;;  %v1268_v24 = vld [vmem:[#allocation4 + $0x28] sm:$0xff] }
 0x19f   : > { %1042 = vst.msk [vmem:[#allocation4 + $0x38] sm:$0xff] %vm1034_vm2, %v1001_v23  ;;  %1041 = vst.msk [vmem:[#allocation4 + $0x30] sm:$0xff] %vm1034_vm2, %v999_v21  ;;  %v1281_v1 = vpack.c.bf16 %v1268_v24, %v1267_v22 }
 0x1a1   : > { %v1457_v28 = vsel %vm1446_vm6, %v1281_v1, 0 }
 0x1a2   : > { %v1107_v46 = vpop.permute.xlu1 %1106  ;;  %v1105_v9 = vpop.permute.xlu0 %1104  ;;  %1728 = vmatpush3.bf16.xpose.msra.mxu1 %v1457_v28 }
 0x1a3   : > { %1148 = vst.msk [vmem:[#allocation4 + $0x38] sm:$0xff] %vm1140_vm3, %v1107_v46  ;;  %1147 = vst.msk [vmem:[#allocation4 + $0x30] sm:$0xff] %vm1140_vm3, %v1105_v9  ;;  %1729 = vmatprep.subr.bf16.mxu1 %v1961_v0 }
 0x1a6   : > { %v1213_v48 = vpop.permute.xlu1 %1212  ;;  %v1211_v49 = vpop.permute.xlu0 %1210 }
 0x1a7   : > { %1254 = vst.msk [vmem:[#allocation4 + $0x38] sm:$0xff] %vm1246_vm4, %v1213_v48  ;;  %1253 = vst.msk [vmem:[#allocation4 + $0x30] sm:$0xff] %vm1246_vm4, %v1211_v49 }
 0x1aa   : > { %v899_v6 = vpop.permute.xlu1 %898  ;;  %v897_v51 = vpop.permute.xlu0 %896 }
 0x1ab   : > { %938 = vst.msk [vmem:[#allocation4 + $0x48] sm:$0xff] %vm928_vm1, %v899_v6  ;;  %937 = vst.msk [vmem:[#allocation4 + $0x40] sm:$0xff] %vm928_vm1, %v897_v51 }
 0x1ae   : > { %v1005_v50 = vpop.permute.xlu1 %1004  ;;  %v1003_v7 = vpop.permute.xlu0 %1002  ;;  %v1269_v52 = vld [vmem:[#allocation4 + $0x30] sm:$0xff]  ;;  %v1270_v37 = vld [vmem:[#allocation4 + $0x38] sm:$0xff] }
 0x1af   : > { %1044 = vst.msk [vmem:[#allocation4 + $0x48] sm:$0xff] %vm1034_vm2, %v1005_v50  ;;  %1043 = vst.msk [vmem:[#allocation4 + $0x40] sm:$0xff] %vm1034_vm2, %v1003_v7  ;;  %v1282_v53 = vpack.c.bf16 %v1270_v37, %v1269_v52 }
 0x1b1   : > { %v1460_v60 = vsel %vm1446_vm6, %v1282_v53, 0 }
 0x1b2   : > { %v1111_v54 = vpop.permute.xlu1 %1110  ;;  %v1109_v38 = vpop.permute.xlu0 %1108  ;;  %1730 = vmatpush3.bf16.xpose.msra.mxu1 %v1460_v60 }
 0x1b3   : > { %1150 = vst.msk [vmem:[#allocation4 + $0x48] sm:$0xff] %vm1140_vm3, %v1111_v54  ;;  %1149 = vst.msk [vmem:[#allocation4 + $0x40] sm:$0xff] %vm1140_vm3, %v1109_v38  ;;  %1731 = vmatprep.subr.bf16.mxu1 %v1961_v0 }
 0x1b6   : > { %v1217_v39 = vpop.permute.xlu1 %1216  ;;  %v1215_v55 = vpop.permute.xlu0 %1214 }
 0x1b7   : > { %1256 = vst.msk [vmem:[#allocation4 + $0x48] sm:$0xff] %vm1246_vm4, %v1217_v39  ;;  %1255 = vst.msk [vmem:[#allocation4 + $0x40] sm:$0xff] %vm1246_vm4, %v1215_v55 }
 0x1ba   : > { %v903_v56 = vpop.permute.xlu1 %902  ;;  %v901_v31 = vpop.permute.xlu0 %900 }
 0x1bb   : > { %940 = vst.msk [vmem:[#allocation4 + $0x58] sm:$0xff] %vm928_vm1, %v903_v56  ;;  %939 = vst.msk [vmem:[#allocation4 + $0x50] sm:$0xff] %vm928_vm1, %v901_v31 }
 0x1be   : > { %v1009_v32 = vpop.permute.xlu1 %1008  ;;  %v1007_v34 = vpop.permute.xlu0 %1006  ;;  %v1271_v57 = vld [vmem:[#allocation4 + $0x40] sm:$0xff]  ;;  %v1272_v58 = vld [vmem:[#allocation4 + $0x48] sm:$0xff] }
 0x1bf   : > { %1046 = vst.msk [vmem:[#allocation4 + $0x58] sm:$0xff] %vm1034_vm2, %v1009_v32  ;;  %1045 = vst.msk [vmem:[#allocation4 + $0x50] sm:$0xff] %vm1034_vm2, %v1007_v34  ;;  %v1283_v61 = vpack.c.bf16 %v1272_v58, %v1271_v57 }
 0x1c1   : > { %v1463_v62 = vsel %vm1446_vm6, %v1283_v61, 0 }
 0x1c2   : > { %v1115_v63 = vpop.permute.xlu1 %1114  ;;  %v1113_v47 = vpop.permute.xlu0 %1112  ;;  %1732 = vmatpush3.bf16.xpose.msra.mxu1 %v1463_v62 }
 0x1c3   : > { %1152 = vst.msk [vmem:[#allocation4 + $0x58] sm:$0xff] %vm1140_vm3, %v1115_v63  ;;  %1151 = vst.msk [vmem:[#allocation4 + $0x50] sm:$0xff] %vm1140_vm3, %v1113_v47  ;;  %1733 = vmatprep.subr.bf16.mxu1 %v1961_v0 }
 0x1c6   : > { %v1221_v2 = vpop.permute.xlu1 %1220  ;;  %v1219_v4 = vpop.permute.xlu0 %1218 }
 0x1c7   : > { %1258 = vst.msk [vmem:[#allocation4 + $0x58] sm:$0xff] %vm1246_vm4, %v1221_v2  ;;  %1257 = vst.msk [vmem:[#allocation4 + $0x50] sm:$0xff] %vm1246_vm4, %v1219_v4 }
 0x1cd   : > { %v907_v5 = vpop.permute.xlu1 %906  ;;  %v905_v59 = vpop.permute.xlu0 %904 }
 0x1ce   : > { %942 = vst.msk [vmem:[#allocation4 + $0x68] sm:$0xff] %vm928_vm1, %v907_v5  ;;  %941 = vst.msk [vmem:[#allocation4 + $0x60] sm:$0xff] %vm928_vm1, %v905_v59  ;;  %v1273_v40 = vld [vmem:[#allocation4 + $0x50] sm:$0xff]  ;;  %v1274_v8 = vld [vmem:[#allocation4 + $0x58] sm:$0xff] }
 0x1cf   : > { %v1284_v41 = vpack.c.bf16 %v1274_v8, %v1273_v40 }
 0x1d1   : > { %v1013_v42 = vpop.permute.xlu1 %1012  ;;  %v1011_v10 = vpop.permute.xlu0 %1010  ;;  %v1466_v12 = vsel %vm1446_vm6, %v1284_v41, 0 }
 0x1d2   : > { %1048 = vst.msk [vmem:[#allocation4 + $0x68] sm:$0xff] %vm1034_vm2, %v1013_v42  ;;  %1047 = vst.msk [vmem:[#allocation4 + $0x60] sm:$0xff] %vm1034_vm2, %v1011_v10  ;;  %1734 = vmatpush3.bf16.xpose.msra.mxu1 %v1466_v12 }
 0x1d3   : > { %1735 = vmatprep.subr.bf16.mxu1 %v1961_v0 }
 0x1d5   : > { %v1119_v13 = vpop.permute.xlu1 %1118  ;;  %v1117_v14 = vpop.permute.xlu0 %1116 }
 0x1d6   : > { %1154 = vst.msk [vmem:[#allocation4 + $0x68] sm:$0xff] %vm1140_vm3, %v1119_v13  ;;  %1153 = vst.msk [vmem:[#allocation4 + $0x60] sm:$0xff] %vm1140_vm3, %v1117_v14 }
 0x1d9   : > { %v1225_v15 = vpop.permute.xlu1 %1224  ;;  %v1223_v25 = vpop.permute.xlu0 %1222 }
 0x1da   : > { %1260 = vst.msk [vmem:[#allocation4 + $0x68] sm:$0xff] %vm1246_vm4, %v1225_v15  ;;  %1259 = vst.msk [vmem:[#allocation4 + $0x60] sm:$0xff] %vm1246_vm4, %v1223_v25 }
 0x1e1   : > { %v1275_v16 = vld [vmem:[#allocation4 + $0x60] sm:$0xff]  ;;  %v1276_v17 = vld [vmem:[#allocation4 + $0x68] sm:$0xff] }
 0x1e2   : > { %v1285_v26 = vpack.c.bf16 %v1276_v17, %v1275_v16 }
 0x1e4   : > { %v1469_v3 = vsel %vm1446_vm6, %v1285_v26, 0 }
 0x1e5   : > { %v911_v43 = vpop.permute.xlu1 %910  ;;  %v909_v33 = vpop.permute.xlu0 %908  ;;  %1736 = vmatpush3.bf16.xpose.msra.mxu1 %v1469_v3 }
 0x1e6   : > { %944 = vst.msk [vmem:[#allocation4 + $0x78] sm:$0xff] %vm928_vm1, %v911_v43  ;;  %943 = vst.msk [vmem:[#allocation4 + $0x70] sm:$0xff] %vm928_vm1, %v909_v33  ;;  %1737 = vmatprep.subr.bf16.mxu1 %v1961_v0 }
 0x1e9   : > { %v1017_v45 = vpop.permute.xlu1 %1016  ;;  %v1015_v36 = vpop.permute.xlu0 %1014 }
 0x1ea   : > { %1050 = vst.msk [vmem:[#allocation4 + $0x78] sm:$0xff] %vm1034_vm2, %v1017_v45  ;;  %1049 = vst.msk [vmem:[#allocation4 + $0x70] sm:$0xff] %vm1034_vm2, %v1015_v36 }
 0x1ed   : > { %v1123_v44 = vpop.permute.xlu1 %1122  ;;  %v1121_v35 = vpop.permute.xlu0 %1120 }
 0x1ee   : > { %1156 = vst.msk [vmem:[#allocation4 + $0x78] sm:$0xff] %vm1140_vm3, %v1123_v44  ;;  %1155 = vst.msk [vmem:[#allocation4 + $0x70] sm:$0xff] %vm1140_vm3, %v1121_v35 }
 0x1f1   : > { %v1229_v18 = vpop.permute.xlu1 %1228  ;;  %v1227_v19 = vpop.permute.xlu0 %1226 }
 0x1f2   : > { %1262 = vst.msk [vmem:[#allocation4 + $0x78] sm:$0xff] %vm1246_vm4, %v1229_v18  ;;  %1261 = vst.msk [vmem:[#allocation4 + $0x70] sm:$0xff] %vm1246_vm4, %v1227_v19 }
 0x1f9   : > { %v1277_v0 = vld [vmem:[#allocation4 + $0x70] sm:$0xff]  ;;  %v1278_v27 = vld [vmem:[#allocation4 + $0x78] sm:$0xff] }
 0x1fa   : > { %v1286_v29 = vpack.c.bf16 %v1278_v27, %v1277_v0 }
 0x1fc   : > { %v1472_v30 = vsel %vm1446_vm6, %v1286_v29, 0 }
 0x1fd   : > { %1738 = vmatpush3.bf16.xpose.msra.mxu1 %v1472_v30 }
 0x202   : > { %v1444_v21 = vpop.permute.xlu0 %1443 }
 0x204   : > { %1740 = vmatmul.mubr.msk.bf16.vlgmr.msra.gmra.mrb[0].mxu1 %vm1446_vm6, %v1287_v11 }
 0x24b   : > { %v1436_v20 = vpop.f32.mrb[0].mxu0 }
 0x24c   : > { %v1722_v23 = vpop.f32.mrb[1].mxu0 }
 0x2d7   : > { %v1508_v22 = vpop.f32.mrb[0].mxu1 }
 0x2d8   : > { %v1509_v24 = vadd.f32 %v1508_v22, %v1444_v21  ;;  %v1741_v1 = vpop.f32.mrb[1].mxu1 }
 0x2d9   : > { %v1511_v28 = vpop.f32.mrb[2].mxu1 }
 0x2da   : > { %v1514_v46 = vadd.f32 %v1509_v24, %v1436_v20  ;;  %v1742_v9 = vpop.f32.mrb[3].mxu1 }
 0x2dc   : > { %vm1515_vm0 = vcmp.gt.f32.partialorder %v1514_v46, 0.0  ;;  %v1516_v48 = vmul.f32 0.2, %v1514_v46 }
 0x2de   : > { %v1517_v49 = vsel %vm1515_vm0, %v1514_v46, %v1516_v48 }
 0x2df   : > { %1518 = vst [vmem:[%s177_s24] sm:$0xf] %v1517_v49 }
 0x2e0   : > { %1878 = shalt.err (!%p1875_p9)
}
 0x2e1   : > { %s1879_s4 = scalar_lea.hbm %s2993_s16, 64  ;;  %s1883_s5 = scalar_lea.hbm %s3053_s3, 256 }
 0x2e2   : > { %p1880_p10 = scmp.ne.s32.totalorder %s2993_s16, %s1879_s4  ;;  %p1884_p13 = scmp.lt.u32.totalorder %s2993_s16, %s3053_s3 }
 0x2e3   : > { %p1885_p0 = scmp.lt.u32.totalorder %s1883_s5, %s1879_s4  ;;  %p1887_p2 = scmp.lt.u32.totalorder %s1879_s4, %s2993_s16 }
 0x2e4   : > { %p1881_p11 = pnand %p1880_p10, %p2045_p3 }
 0x2e5   : > { %p1886_p1 = por %p1885_p0, %p1884_p13 }
 0x2e6   : > { %p1882_p12 = pneg %p1881_p11 }
 0x2e7   : > { %p1888_p4 = por %p1887_p2, %p1886_p1 }
 0x2e9   : > { %p1889_p5 = pnand %p1888_p4, %p1882_p12 }
 0x2eb   : > { %1892 = shalt.err (!%p1889_p5)
}
 0x2ec   : > { %1775 = dma.vmem_to_hbm [thread:$0]  (%p2045_p3), %s2995_s10, 64, %s2993_s16, %s1520_s15  }
 0x2ed PF: > { %p1781_p6 = scmp.ge.s32.totalorder %s1959_s19, 2  ;;  %s1547_s9 = sand.u32 1, %s1931_s12  }
 0x2ee   : > { %s1548_s11 = scalar_lea.sflag [#allocation6], %s1547_s9 }
 0x2ef   : > { %p1778_p7 = pnand %p1781_p6, %p2054_p8 }
 0x2f1   : > { %1926 = dma.done.wait (!%p1778_p7), %s1548_s11, 64  }
 0x2f2   : > { %1928 = vsyncadd (!%p1778_p7), %s1548_s11, 4294967232  ;;  %s16_s19 = sadd.s32 1, %s1959_s19   ;;  %s3058_s12 = smov %s1935_s13 }
 0x2f3   : > { %p13_p9 = scmp.ge.s32.totalorder %s16_s19, 6   ;;  %s3059_s13 = smov %s1939_s14 }
 0x2f4   : > { %s3060_s14 = smov %s2063_s30  ;;  %s3061_s15 = smov %s1951_s17 }
 0x2f5   : > { %s3062_s16 = smov %s1955_s18  ;;  %s3063_s17 = smov %s3066_s22 }
 0x2f6   : > { %s3064_s18 = smov %s3070_s23  ;;  %15 = sbr.rel (!%p13_p9) target bundleno = 5 (0x5), region = 80 }
 0x2fd   :  { %1553 = vsyncpa [#allocation6], 1 }
 0x2fe   :  { %1555 = vsyncpa [#allocation6 + $0x1], 1 }

</bundles_post_ra>
